<compile_context>
chip_gen: v5e
topology: v5e:2x2
jax: 0.10.0
libtpu: 0.0.40
codegen_flags: <defaults>
</compile_context>

<pallas_src>
import functools
import math

import jax
import jax.numpy as jnp
from jax.experimental import pallas as pl
from jax.experimental.pallas import tpu as pltpu


def _pick_tile(s: int, target: int = 128) -> int:
    """Largest divisor of s that is a multiple of 8 and <= target, else s."""
    if s <= target:
        return s
    for t in range(target, 7, -8):
        if s % t == 0:
            return t
    return s


def _mhsa_kernel(q_ref, k_ref, v_ref, wq_ref, wk_ref, wv_ref, wo_ref,
                 out_ref, merged_ref,
                 qp_ref, m_ref, l_ref, acc_ref, *kv_cache_refs,
                 head: int, head_dim: int, scale: float,
                 kv_tile: int, cache_kv: bool,
                 compute_dtype, approx_recip: bool):
    qi = pl.program_id(1)
    ki = pl.program_id(2)
    nkv = pl.num_programs(2)

    # ---- init per (batch, q-tile): project Q once, reset online-softmax state.
    @pl.when(ki == 0)
    def _init():
        q = q_ref[0]                                               # (tq, E)
        qp = jnp.dot(q, wq_ref[...],
                     preferred_element_type=jnp.float32) * scale   # (tq, E) f32
        qp = qp.astype(compute_dtype)
        tq = qp.shape[0]
        # head-major layout for batched einsum: (H, tq, Dh)
        qp_ref[...] = qp.reshape(tq, head, head_dim).transpose(1, 0, 2)
        m_ref[...] = jnp.full(m_ref.shape, -jnp.inf, dtype=m_ref.dtype)
        l_ref[...] = jnp.zeros(l_ref.shape, dtype=l_ref.dtype)
        acc_ref[...] = jnp.zeros(acc_ref.shape, dtype=acc_ref.dtype)

    def _project_kv():
        # project this K/V tile and split heads: (tk, E) -> (H, tk, Dh)
        k = k_ref[0]                                               # (tk, E)
        v = v_ref[0]                                               # (tk, E)
        tk = k.shape[0]
        kp = jnp.dot(k, wk_ref[...], preferred_element_type=jnp.float32)
        vp = jnp.dot(v, wv_ref[...], preferred_element_type=jnp.float32)
        kp = kp.astype(compute_dtype).reshape(tk, head, head_dim).transpose(1, 0, 2)
        vp = vp.astype(compute_dtype).reshape(tk, head, head_dim).transpose(1, 0, 2)
        return kp, vp

    if cache_kv:
        kcache_ref, vcache_ref = kv_cache_refs
        off = ki * kv_tile
        if kv_tile % 8 == 0:
            off = pl.multiple_of(off, kv_tile)

        # K/V projection only on the first query tile; later q-tiles reuse the cache.
        @pl.when(qi == 0)
        def _fill_cache():
            kp_new, vp_new = _project_kv()
            kcache_ref[:, pl.ds(off, kv_tile), :] = kp_new
            vcache_ref[:, pl.ds(off, kv_tile), :] = vp_new

        kp = kcache_ref[:, pl.ds(off, kv_tile), :]                 # (H, tk, Dh)
        vp = vcache_ref[:, pl.ds(off, kv_tile), :]
    else:
        kp, vp = _project_kv()

    # ---- batched scores over heads: (H, tq, tk), f32
    s = jnp.einsum("hqd,hkd->hqk", qp_ref[...], kp,
                   preferred_element_type=jnp.float32)

    # ---- online (flash) softmax update, all f32
    m_prev = m_ref[...]
    m_new = jnp.maximum(m_prev, jnp.max(s, axis=-1, keepdims=True))
    alpha = jnp.exp(m_prev - m_new)
    p = jnp.exp(s - m_new)
    l_ref[...] = alpha * l_ref[...] + jnp.sum(p, axis=-1, keepdims=True)
    acc_ref[...] = alpha * acc_ref[...] + jnp.einsum(
        "hqk,hkd->hqd", p.astype(compute_dtype), vp,
        preferred_element_type=jnp.float32)
    m_ref[...] = m_new

    # ---- finalize: normalize, merge heads (lane-dense), output projection.
    @pl.when(ki == nkv - 1)
    def _finalize():
        inv_l = pl.reciprocal(l_ref[...], approx=approx_recip)     # (H, tq, 1)
        ctx = acc_ref[...] * inv_l                                 # (H, tq, Dh) f32
        tq = ctx.shape[1]
        merged = ctx.transpose(1, 0, 2).reshape(tq, head * head_dim)  # (tq, E)
        merged_ref[0] = merged.astype(merged_ref.dtype)
        out = jnp.dot(merged.astype(compute_dtype), wo_ref[...],
                      preferred_element_type=jnp.float32)
        out_ref[0] = out.astype(out_ref.dtype)


def multi_head_self_attention(q, k, v, wq, wk, wv, wo, *, head: int,
                              compute_dtype=jnp.bfloat16,
                              q_tile=None, kv_tile=None,
                              kv_cache_vmem_budget=12 * 1024 * 1024):
    """q, k, v: (B, S, E). Weights (E, E) in PyTorch Linear layout (out, in).

    Returns (output, context_aware_scores):
      output: (B, S, E)
      context_aware_scores: (B, head, S, E // head)
    """
    B, S, E = q.shape
    assert E % head == 0, "embedding_size must be divisible by head"
    Dh = E // head
    out_dtype = q.dtype

    tq = _pick_tile(S) if q_tile is None else q_tile
    tk = _pick_tile(S) if kv_tile is None else kv_tile
    assert S % tq == 0 and S % tk == 0
    nq, nk = S // tq, S // tk

    # Decide whether projected K/V for the whole sequence fits a VMEM cache
    # (accounting for lane padding of the Dh minor dim and sublane padding of S).
    c_bytes = jnp.dtype(compute_dtype).itemsize
    o_bytes = jnp.dtype(out_dtype).itemsize
    padded_dh = ((Dh + 127) // 128) * 128
    padded_s = ((S + 7) // 8) * 8
    kv_cache_bytes = 2 * head * padded_s * padded_dh * c_bytes
    cache_kv = (nq > 1) and (kv_cache_bytes <= kv_cache_vmem_budget)

    # ---- wrapper-side layout plumbing: pre-transpose weights, cast MXU operands.
    wq_t = wq.T.astype(compute_dtype)
    wk_t = wk.T.astype(compute_dtype)
    wv_t = wv.T.astype(compute_dtype)
    wo_t = wo.T.astype(compute_dtype)
    qc = q.astype(compute_dtype)
    kc = k.astype(compute_dtype)
    vc = v.astype(compute_dtype)

    approx_recip = bool(jnp.dtype(compute_dtype) != jnp.dtype(jnp.float32))
    kernel = functools.partial(
        _mhsa_kernel, head=head, head_dim=Dh,
        scale=1.0 / math.sqrt(float(Dh)),
        kv_tile=tk, cache_kv=cache_kv,
        compute_dtype=compute_dtype, approx_recip=approx_recip)

    q_spec = pl.BlockSpec((1, tq, E), lambda b, qi, ki: (b, qi, 0))
    if cache_kv:
        # Only the qi == 0 sweep reads raw K/V (to fill the VMEM cache); keep the
        # block index constant afterwards so Pallas skips the redundant re-fetch DMAs.
        def kv_index(b, qi, ki):
            return (b, jnp.where(qi == 0, ki, 0), 0)
    else:
        def kv_index(b, qi, ki):
            return (b, ki, 0)
    kv_spec = pl.BlockSpec((1, tk, E), kv_index)
    # Constant index_map: weights stay resident in VMEM across the grid.
    w_spec = pl.BlockSpec((E, E), lambda b, qi, ki: (0, 0))
    o_spec = pl.BlockSpec((1, tq, E), lambda b, qi, ki: (b, qi, 0))

    scratch_shapes = [
        pltpu.VMEM((head, tq, Dh), compute_dtype),   # projected Q (head-major)
        pltpu.VMEM((head, tq, 1), jnp.float32),      # running max m
        pltpu.VMEM((head, tq, 1), jnp.float32),      # running denom l
        pltpu.VMEM((head, tq, Dh), jnp.float32),     # output accumulator
    ]
    if cache_kv:
        scratch_shapes += [
            pltpu.VMEM((head, S, Dh), compute_dtype),  # projected K cache
            pltpu.VMEM((head, S, Dh), compute_dtype),  # projected V cache
        ]

    if cache_kv:
        # KV cache persists across the q-tile axis -> it must stay "arbitrary".
        dims = ("parallel", "arbitrary", "arbitrary")
    else:
        dims = ("parallel", "parallel", "arbitrary")

    # Advisory cost estimate for XLA scheduling around the custom call.
    flops = 8 * B * S * E * E + 4 * B * S * S * E
    transcendentals = B * head * S * S
    bytes_accessed = (3 * B * S * E + 4 * E * E) * c_bytes + 2 * B * S * E * o_bytes

    out, merged = pl.pallas_call(
        kernel,
        out_shape=(
            jax.ShapeDtypeStruct((B, S, E), out_dtype),
            jax.ShapeDtypeStruct((B, S, E), out_dtype),
        ),
        grid_spec=pltpu.PrefetchScalarGridSpec(
            num_scalar_prefetch=0,
            grid=(B, nq, nk),
            in_specs=[q_spec, kv_spec, kv_spec,
                      w_spec, w_spec, w_spec, w_spec],
            out_specs=[o_spec, o_spec],
            scratch_shapes=scratch_shapes),
        compiler_params=pltpu.CompilerParams(
            dimension_semantics=dims,
            vmem_limit_bytes=32 * 1024 * 1024),
        cost_estimate=pl.CostEstimate(
            flops=int(flops),
            transcendentals=int(transcendentals),
            bytes_accessed=int(bytes_accessed)),
    )(qc, kc, vc, wq_t, wk_t, wv_t, wo_t)

    # Pure layout reshape/transpose outside the kernel (no masked Dh-wide stores).
    ctx = merged.reshape(B, S, head, Dh).transpose(0, 2, 1, 3)
    return out, ctx


def _reference(q, k, v, wq, wk, wv, wo, head):
    """Pure-JAX reference mirroring the PyTorch module (f32)."""
    B, S, E = q.shape
    Dh = E // head
    Q = q @ wq.T
    K = k @ wk.T
    V = v @ wv.T

    def split(x):  # (B,S,E) -> (B,H,S,Dh)
        return x.reshape(B, S, head, Dh).transpose(0, 2, 1, 3)

    qs, ks, vs = split(Q), split(K), split(V)
    scores = jnp.einsum("bhqd,bhkd->bhqk", qs, ks) / jnp.sqrt(float(Dh))
    p = jax.nn.softmax(scores, axis=-1)
    ctx = jnp.einsum("bhqk,bhkd->bhqd", p, vs)
    merged = ctx.transpose(0, 2, 1, 3).reshape(B, S, E)
    return merged @ wo.T, ctx


def _run_case(B, S, E, HEAD):
    key = jax.random.PRNGKey(0)
    kq, kk, kv_, k1, k2, k3, k4 = jax.random.split(key, 7)

    q = jax.random.normal(kq, (B, S, E), dtype=jnp.float32)
    k = jax.random.normal(kk, (B, S, E), dtype=jnp.float32)
    v = jax.random.normal(kv_, (B, S, E), dtype=jnp.float32)

    # Deterministic "Linear" weights, PyTorch layout (out_features, in_features).
    scale = 1.0 / math.sqrt(E)
    wq = jax.random.uniform(k1, (E, E), jnp.float32, -scale, scale)
    wk = jax.random.uniform(k2, (E, E), jnp.float32, -scale, scale)
    wv = jax.random.uniform(k3, (E, E), jnp.float32, -scale, scale)
    wo = jax.random.uniform(k4, (E, E), jnp.float32, -scale, scale)

    ref_out, ref_ctx = _reference(q, k, v, wq, wk, wv, wo, HEAD)

    # ---- f32 compute path: strict numerical check vs. the reference.
    out32, ctx32 = multi_head_self_attention(q, k, v, wq, wk, wv, wo,
                                             head=HEAD,
                                             compute_dtype=jnp.float32)
    out32 = jax.block_until_ready(out32)
    ctx32 = jax.block_until_ready(ctx32)
    assert out32.shape == (B, S, E) and ctx32.shape == (B, HEAD, S, E // HEAD)
    assert jnp.allclose(out32, ref_out, atol=2e-4, rtol=2e-4)
    assert jnp.allclose(ctx32, ref_ctx, atol=2e-4, rtol=2e-4)

    # ---- bf16 compute path (MXU-friendly): loose tolerance check.
    out16, ctx16 = multi_head_self_attention(q, k, v, wq, wk, wv, wo,
                                             head=HEAD,
                                             compute_dtype=jnp.bfloat16)
    out16 = jax.block_until_ready(out16)
    ctx16 = jax.block_until_ready(ctx16)
    assert out16.shape == (B, S, E) and ctx16.shape == (B, HEAD, S, E // HEAD)
    assert jnp.allclose(out16.astype(jnp.float32), ref_out, atol=6e-2, rtol=6e-2)
    assert jnp.allclose(ctx16.astype(jnp.float32), ref_ctx, atol=6e-2, rtol=6e-2)


if __name__ == "__main__":
    # Small module-consistent shape (single-tile path).
    _run_case(B=2, S=8, E=32, HEAD=4)
    # Multi-tile path: exercises flash accumulation + the VMEM K/V projection cache.
    _run_case(B=2, S=256, E=128, HEAD=4)
    print("KERNEL_OK")
</pallas_src>

<mosaic_0001>
module attributes {stable_mosaic.version = 11 : i64} {
  func.func @_mhsa_kernel(%arg0: i32, %arg1: i32, %arg2: i32, %arg3: memref<1x8x32xf32, #tpu.memory_space<vmem>>, %arg4: memref<1x8x32xf32, #tpu.memory_space<vmem>>, %arg5: memref<1x8x32xf32, #tpu.memory_space<vmem>>, %arg6: memref<32x32xf32, #tpu.memory_space<vmem>>, %arg7: memref<32x32xf32, #tpu.memory_space<vmem>>, %arg8: memref<32x32xf32, #tpu.memory_space<vmem>>, %arg9: memref<32x32xf32, #tpu.memory_space<vmem>>, %arg10: memref<1x8x32xf32, #tpu.memory_space<vmem>>, %arg11: memref<1x8x32xf32, #tpu.memory_space<vmem>>, %arg12: memref<4x8x8xf32, #tpu.memory_space<vmem>>, %arg13: memref<4x8x1xf32, #tpu.memory_space<vmem>>, %arg14: memref<4x8x1xf32, #tpu.memory_space<vmem>>, %arg15: memref<4x8x8xf32, #tpu.memory_space<vmem>>) attributes {dimension_semantics = [#tpu.dimension_semantics<parallel>, #tpu.dimension_semantics<parallel>, #tpu.dimension_semantics<arbitrary>], iteration_bounds = array<i64: 2, 1, 1>, scalar_prefetch = 0 : i64, scratch_operands = 4 : i64, tpu.core_type = #tpu.core_type<tc>, window_params = [{transform_indices = @transform_0, window_bounds = array<i64: 1, 8, 32>}, {transform_indices = @transform_1, window_bounds = array<i64: 1, 8, 32>}, {transform_indices = @transform_2, window_bounds = array<i64: 1, 8, 32>}, {pipeline_mode = #tpu.pipeline_mode<synchronous>, transform_indices = @transform_3, window_bounds = array<i64: 32, 32>}, {pipeline_mode = #tpu.pipeline_mode<synchronous>, transform_indices = @transform_4, window_bounds = array<i64: 32, 32>}, {pipeline_mode = #tpu.pipeline_mode<synchronous>, transform_indices = @transform_5, window_bounds = array<i64: 32, 32>}, {pipeline_mode = #tpu.pipeline_mode<synchronous>, transform_indices = @transform_6, window_bounds = array<i64: 32, 32>}, {transform_indices = @transform_7, window_bounds = array<i64: 1, 8, 32>}, {transform_indices = @transform_8, window_bounds = array<i64: 1, 8, 32>}]} {
    %c0_i32 = arith.constant 0 : i32
    %0 = arith.cmpi eq, %arg2, %c0_i32 : i32
    %1 = arith.extui %0 : i1 to i32
    %c0_i32_0 = arith.constant 0 : i32
    %2 = arith.cmpi ne, %1, %c0_i32_0 : i32
    scf.if %2 {
      %c0_38 = arith.constant 0 : index
      %c0_39 = arith.constant 0 : index
      %c0_40 = arith.constant 0 : index
      %42 = vector.load %arg3[%c0_38, %c0_39, %c0_40] : memref<1x8x32xf32, #tpu.memory_space<vmem>>, vector<1x8x32xf32>
      %43 = vector.shape_cast %42 : vector<1x8x32xf32> to vector<8x32xf32>
      %c0_41 = arith.constant 0 : index
      %c0_42 = arith.constant 0 : index
      %44 = vector.load %arg6[%c0_41, %c0_42] : memref<32x32xf32, #tpu.memory_space<vmem>>, vector<32x32xf32>
      %cst_43 = arith.constant dense<0.000000e+00> : vector<8x32xf32>
      %45 = tpu.matmul %43, %44, %cst_43 {dimension_numbers = #tpu.dot_dimension_numbers<[1], [0], [0], [1], [0, 0, 1, 1], [], []>} : vector<8x32xf32>, vector<32x32xf32>, vector<8x32xf32> -> vector<8x32xf32>
      %cst_44 = arith.constant 0.353553385 : f32
      %46 = vector.broadcast %cst_44 : f32 to vector<8x32xf32>
      %47 = arith.mulf %45, %46 : vector<8x32xf32>
      %48 = vector.shape_cast %47 : vector<8x32xf32> to vector<8x4x8xf32>
      %49 = tpu.transpose %48, [1, 0, 2] : vector<8x4x8xf32> -> vector<4x8x8xf32>
      %c0_45 = arith.constant 0 : index
      %c0_46 = arith.constant 0 : index
      %c0_47 = arith.constant 0 : index
      %50 = vector.load %arg12[%c0_45, %c0_46, %c0_47] : memref<4x8x8xf32, #tpu.memory_space<vmem>>, vector<4x8x8xf32>
      tpu.vector_store %arg12[%c0_45, %c0_46, %c0_47], %49 {strides = array<i32>} : memref<4x8x8xf32, #tpu.memory_space<vmem>>, vector<4x8x8xf32>,
      %cst_48 = arith.constant 0xFF800000 : f32
      %51 = vector.broadcast %cst_48 : f32 to vector<4x8x1xf32>
      %c0_49 = arith.constant 0 : index
      %c0_50 = arith.constant 0 : index
      %c0_51 = arith.constant 0 : index
      %52 = vector.load %arg13[%c0_49, %c0_50, %c0_51] : memref<4x8x1xf32, #tpu.memory_space<vmem>>, vector<4x8x1xf32>
      tpu.vector_store %arg13[%c0_49, %c0_50, %c0_51], %51 {strides = array<i32>} : memref<4x8x1xf32, #tpu.memory_space<vmem>>, vector<4x8x1xf32>,
      %cst_52 = arith.constant 0.000000e+00 : f32
      %53 = vector.broadcast %cst_52 : f32 to vector<4x8x1xf32>
      %c0_53 = arith.constant 0 : index
      %c0_54 = arith.constant 0 : index
      %c0_55 = arith.constant 0 : index
      %54 = vector.load %arg14[%c0_53, %c0_54, %c0_55] : memref<4x8x1xf32, #tpu.memory_space<vmem>>, vector<4x8x1xf32>
      tpu.vector_store %arg14[%c0_53, %c0_54, %c0_55], %53 {strides = array<i32>} : memref<4x8x1xf32, #tpu.memory_space<vmem>>, vector<4x8x1xf32>,
      %cst_56 = arith.constant 0.000000e+00 : f32
      %55 = vector.broadcast %cst_56 : f32 to vector<4x8x8xf32>
      %c0_57 = arith.constant 0 : index
      %c0_58 = arith.constant 0 : index
      %c0_59 = arith.constant 0 : index
      %56 = vector.load %arg15[%c0_57, %c0_58, %c0_59] : memref<4x8x8xf32, #tpu.memory_space<vmem>>, vector<4x8x8xf32>
      tpu.vector_store %arg15[%c0_57, %c0_58, %c0_59], %55 {strides = array<i32>} : memref<4x8x8xf32, #tpu.memory_space<vmem>>, vector<4x8x8xf32>,
    } else {
    }
    %c0 = arith.constant 0 : index
    %c0_1 = arith.constant 0 : index
    %c0_2 = arith.constant 0 : index
    %3 = vector.load %arg4[%c0, %c0_1, %c0_2] : memref<1x8x32xf32, #tpu.memory_space<vmem>>, vector<1x8x32xf32>
    %4 = vector.shape_cast %3 : vector<1x8x32xf32> to vector<8x32xf32>
    %c0_3 = arith.constant 0 : index
    %c0_4 = arith.constant 0 : index
    %c0_5 = arith.constant 0 : index
    %5 = vector.load %arg5[%c0_3, %c0_4, %c0_5] : memref<1x8x32xf32, #tpu.memory_space<vmem>>, vector<1x8x32xf32>
    %6 = vector.shape_cast %5 : vector<1x8x32xf32> to vector<8x32xf32>
    %c0_6 = arith.constant 0 : index
    %c0_7 = arith.constant 0 : index
    %7 = vector.load %arg7[%c0_6, %c0_7] : memref<32x32xf32, #tpu.memory_space<vmem>>, vector<32x32xf32>
    %cst = arith.constant dense<0.000000e+00> : vector<8x32xf32>
    %8 = tpu.matmul %4, %7, %cst {dimension_numbers = #tpu.dot_dimension_numbers<[1], [0], [0], [1], [0, 0, 1, 1], [], []>} : vector<8x32xf32>, vector<32x32xf32>, vector<8x32xf32> -> vector<8x32xf32>
    %c0_8 = arith.constant 0 : index
    %c0_9 = arith.constant 0 : index
    %9 = vector.load %arg8[%c0_8, %c0_9] : memref<32x32xf32, #tpu.memory_space<vmem>>, vector<32x32xf32>
    %cst_10 = arith.constant dense<0.000000e+00> : vector<8x32xf32>
    %10 = tpu.matmul %6, %9, %cst_10 {dimension_numbers = #tpu.dot_dimension_numbers<[1], [0], [0], [1], [0, 0, 1, 1], [], []>} : vector<8x32xf32>, vector<32x32xf32>, vector<8x32xf32> -> vector<8x32xf32>
    %11 = vector.shape_cast %8 : vector<8x32xf32> to vector<8x4x8xf32>
    %12 = tpu.transpose %11, [1, 0, 2] : vector<8x4x8xf32> -> vector<4x8x8xf32>
    %13 = vector.shape_cast %10 : vector<8x32xf32> to vector<8x4x8xf32>
    %14 = tpu.transpose %13, [1, 0, 2] : vector<8x4x8xf32> -> vector<4x8x8xf32>
    %c0_11 = arith.constant 0 : index
    %c0_12 = arith.constant 0 : index
    %c0_13 = arith.constant 0 : index
    %15 = vector.load %arg12[%c0_11, %c0_12, %c0_13] : memref<4x8x8xf32, #tpu.memory_space<vmem>>, vector<4x8x8xf32>
    "tpu.trace_start"() <{level = 10 : i32, message = "hqd,hkd->hqk"}> : () -> ()
    %cst_14 = arith.constant dense<0.000000e+00> : vector<4x8x8xf32>
    %16 = tpu.matmul %15, %12, %cst_14 {dimension_numbers = #tpu.dot_dimension_numbers<[2], [2], [1], [1], [0, 0, 0, 1, 1, 1], [0], [0]>} : vector<4x8x8xf32>, vector<4x8x8xf32>, vector<4x8x8xf32> -> vector<4x8x8xf32>
    "tpu.trace_stop"() : () -> ()
    %c0_15 = arith.constant 0 : index
    %c0_16 = arith.constant 0 : index
    %c0_17 = arith.constant 0 : index
    %17 = vector.load %arg13[%c0_15, %c0_16, %c0_17] : memref<4x8x1xf32, #tpu.memory_space<vmem>>, vector<4x8x1xf32>
    %cst_18 = arith.constant dense<0xFF800000> : vector<4x8xf32>
    %18 = vector.multi_reduction <maximumf>, %16, %cst_18 [2] : vector<4x8x8xf32> to vector<4x8xf32>
    %19 = vector.shape_cast %18 : vector<4x8xf32> to vector<4x8x1xf32>
    %20 = arith.maximumf %17, %19 : vector<4x8x1xf32>
    %21 = arith.subf %17, %20 : vector<4x8x1xf32>
    %22 = math.exp %21 : vector<4x8x1xf32>
    %23 = vector.broadcast %20 : vector<4x8x1xf32> to vector<4x8x8xf32>
    %24 = arith.subf %16, %23 : vector<4x8x8xf32>
    %25 = math.exp %24 : vector<4x8x8xf32>
    %c0_19 = arith.constant 0 : index
    %c0_20 = arith.constant 0 : index
    %c0_21 = arith.constant 0 : index
    %26 = vector.load %arg14[%c0_19, %c0_20, %c0_21] : memref<4x8x1xf32, #tpu.memory_space<vmem>>, vector<4x8x1xf32>
    %27 = arith.mulf %22, %26 : vector<4x8x1xf32>
    %cst_22 = arith.constant dense<0.000000e+00> : vector<4x8xf32>
    %28 = vector.multi_reduction <add>, %25, %cst_22 [2] : vector<4x8x8xf32> to vector<4x8xf32>
    %29 = vector.shape_cast %28 : vector<4x8xf32> to vector<4x8x1xf32>
    %30 = arith.addf %27, %29 : vector<4x8x1xf32>
    %c0_23 = arith.constant 0 : index
    %c0_24 = arith.constant 0 : index
    %c0_25 = arith.constant 0 : index
    %31 = vector.load %arg14[%c0_23, %c0_24, %c0_25] : memref<4x8x1xf32, #tpu.memory_space<vmem>>, vector<4x8x1xf32>
    tpu.vector_store %arg14[%c0_23, %c0_24, %c0_25], %30 {strides = array<i32>} : memref<4x8x1xf32, #tpu.memory_space<vmem>>, vector<4x8x1xf32>,
    %c0_26 = arith.constant 0 : index
    %c0_27 = arith.constant 0 : index
    %c0_28 = arith.constant 0 : index
    %32 = vector.load %arg15[%c0_26, %c0_27, %c0_28] : memref<4x8x8xf32, #tpu.memory_space<vmem>>, vector<4x8x8xf32>
    %33 = vector.broadcast %22 : vector<4x8x1xf32> to vector<4x8x8xf32>
    %34 = arith.mulf %33, %32 : vector<4x8x8xf32>
    "tpu.trace_start"() <{level = 10 : i32, message = "hqk,hkd->hqd"}> : () -> ()
    %cst_29 = arith.constant dense<0.000000e+00> : vector<4x8x8xf32>
    %35 = tpu.matmul %25, %14, %cst_29 {dimension_numbers = #tpu.dot_dimension_numbers<[2], [1], [1], [2], [0, 0, 0, 1, 1, 2], [0], [0]>} : vector<4x8x8xf32>, vector<4x8x8xf32>, vector<4x8x8xf32> -> vector<4x8x8xf32>
    "tpu.trace_stop"() : () -> ()
    %36 = arith.addf %34, %35 : vector<4x8x8xf32>
    %c0_30 = arith.constant 0 : index
    %c0_31 = arith.constant 0 : index
    %c0_32 = arith.constant 0 : index
    %37 = vector.load %arg15[%c0_30, %c0_31, %c0_32] : memref<4x8x8xf32, #tpu.memory_space<vmem>>, vector<4x8x8xf32>
    tpu.vector_store %arg15[%c0_30, %c0_31, %c0_32], %36 {strides = array<i32>} : memref<4x8x8xf32, #tpu.memory_space<vmem>>, vector<4x8x8xf32>,
    %c0_33 = arith.constant 0 : index
    %c0_34 = arith.constant 0 : index
    %c0_35 = arith.constant 0 : index
    %38 = vector.load %arg13[%c0_33, %c0_34, %c0_35] : memref<4x8x1xf32, #tpu.memory_space<vmem>>, vector<4x8x1xf32>
    tpu.vector_store %arg13[%c0_33, %c0_34, %c0_35], %20 {strides = array<i32>} : memref<4x8x1xf32, #tpu.memory_space<vmem>>, vector<4x8x1xf32>,
    %c0_i32_36 = arith.constant 0 : i32
    %39 = arith.cmpi eq, %arg2, %c0_i32_36 : i32
    %40 = arith.extui %39 : i1 to i32
    %c0_i32_37 = arith.constant 0 : i32
    %41 = arith.cmpi ne, %40, %c0_i32_37 : i32
    scf.if %41 {
      %c0_38 = arith.constant 0 : index
      %c0_39 = arith.constant 0 : index
      %c0_40 = arith.constant 0 : index
      %42 = vector.load %arg14[%c0_38, %c0_39, %c0_40] : memref<4x8x1xf32, #tpu.memory_space<vmem>>, vector<4x8x1xf32>
      %43 = tpu.reciprocal %42 : vector<4x8x1xf32> -> vector<4x8x1xf32>
      %c0_41 = arith.constant 0 : index
      %c0_42 = arith.constant 0 : index
      %c0_43 = arith.constant 0 : index
      %44 = vector.load %arg15[%c0_41, %c0_42, %c0_43] : memref<4x8x8xf32, #tpu.memory_space<vmem>>, vector<4x8x8xf32>
      %45 = vector.broadcast %43 : vector<4x8x1xf32> to vector<4x8x8xf32>
      %46 = arith.mulf %44, %45 : vector<4x8x8xf32>
      %47 = tpu.transpose %46, [1, 0, 2] : vector<4x8x8xf32> -> vector<8x4x8xf32>
      %48 = vector.shape_cast %47 : vector<8x4x8xf32> to vector<8x32xf32>
      %c0_44 = arith.constant 0 : index
      %c0_45 = arith.constant 0 : index
      %c0_46 = arith.constant 0 : index
      %49 = vector.load %arg11[%c0_44, %c0_45, %c0_46] : memref<1x8x32xf32, #tpu.memory_space<vmem>>, vector<1x8x32xf32>
      %50 = vector.shape_cast %49 : vector<1x8x32xf32> to vector<8x32xf32>
      %51 = vector.shape_cast %48 : vector<8x32xf32> to vector<1x8x32xf32>
      tpu.vector_store %arg11[%c0_44, %c0_45, %c0_46], %51 {strides = array<i32>} : memref<1x8x32xf32, #tpu.memory_space<vmem>>, vector<1x8x32xf32>,
      %c0_47 = arith.constant 0 : index
      %c0_48 = arith.constant 0 : index
      %52 = vector.load %arg9[%c0_47, %c0_48] : memref<32x32xf32, #tpu.memory_space<vmem>>, vector<32x32xf32>
      %cst_49 = arith.constant dense<0.000000e+00> : vector<8x32xf32>
      %53 = tpu.matmul %48, %52, %cst_49 {dimension_numbers = #tpu.dot_dimension_numbers<[1], [0], [0], [1], [0, 0, 1, 1], [], []>} : vector<8x32xf32>, vector<32x32xf32>, vector<8x32xf32> -> vector<8x32xf32>
      %c0_50 = arith.constant 0 : index
      %c0_51 = arith.constant 0 : index
      %c0_52 = arith.constant 0 : index
      %54 = vector.load %arg10[%c0_50, %c0_51, %c0_52] : memref<1x8x32xf32, #tpu.memory_space<vmem>>, vector<1x8x32xf32>
      %55 = vector.shape_cast %54 : vector<1x8x32xf32> to vector<8x32xf32>
      %56 = vector.shape_cast %53 : vector<8x32xf32> to vector<1x8x32xf32>
      tpu.vector_store %arg10[%c0_50, %c0_51, %c0_52], %56 {strides = array<i32>} : memref<1x8x32xf32, #tpu.memory_space<vmem>>, vector<1x8x32xf32>,
    } else {
    }
    return
  }
  func.func @transform_0(%arg0: i32, %arg1: i32, %arg2: i32) -> (i32, i32, i32) {
    %c0_i32 = arith.constant 0 : i32
    %c0_i32_0 = arith.constant 0 : i32
    return %arg0, %arg1, %c0_i32 : i32, i32, i32
  }
  func.func @transform_1(%arg0: i32, %arg1: i32, %arg2: i32) -> (i32, i32, i32) {
    %c0_i32 = arith.constant 0 : i32
    %c0_i32_0 = arith.constant 0 : i32
    return %arg0, %arg2, %c0_i32 : i32, i32, i32
  }
  func.func @transform_2(%arg0: i32, %arg1: i32, %arg2: i32) -> (i32, i32, i32) {
    %c0_i32 = arith.constant 0 : i32
    %c0_i32_0 = arith.constant 0 : i32
    return %arg0, %arg2, %c0_i32 : i32, i32, i32
  }
  func.func @transform_3(%arg0: i32, %arg1: i32, %arg2: i32) -> (i32, i32) {
    %c0_i32 = arith.constant 0 : i32
    %c0_i32_0 = arith.constant 0 : i32
    %c0_i32_1 = arith.constant 0 : i32
    return %c0_i32, %c0_i32_0 : i32, i32
  }
  func.func @transform_4(%arg0: i32, %arg1: i32, %arg2: i32) -> (i32, i32) {
    %c0_i32 = arith.constant 0 : i32
    %c0_i32_0 = arith.constant 0 : i32
    %c0_i32_1 = arith.constant 0 : i32
    return %c0_i32, %c0_i32_0 : i32, i32
  }
  func.func @transform_5(%arg0: i32, %arg1: i32, %arg2: i32) -> (i32, i32) {
    %c0_i32 = arith.constant 0 : i32
    %c0_i32_0 = arith.constant 0 : i32
    %c0_i32_1 = arith.constant 0 : i32
    return %c0_i32, %c0_i32_0 : i32, i32
  }
  func.func @transform_6(%arg0: i32, %arg1: i32, %arg2: i32) -> (i32, i32) {
    %c0_i32 = arith.constant 0 : i32
    %c0_i32_0 = arith.constant 0 : i32
    %c0_i32_1 = arith.constant 0 : i32
    return %c0_i32, %c0_i32_0 : i32, i32
  }
  func.func @transform_7(%arg0: i32, %arg1: i32, %arg2: i32) -> (i32, i32, i32) {
    %c0_i32 = arith.constant 0 : i32
    %c0_i32_0 = arith.constant 0 : i32
    return %arg0, %arg1, %c0_i32 : i32, i32, i32
  }
  func.func @transform_8(%arg0: i32, %arg1: i32, %arg2: i32) -> (i32, i32, i32) {
    %c0_i32 = arith.constant 0 : i32
    %c0_i32_0 = arith.constant 0 : i32
    return %arg0, %arg1, %c0_i32 : i32, i32, i32
  }
}

</mosaic_0001>

<bundles_post_ra>
// kernel: tpu_custom_call.1
= control target key start
LH: loop header
LB: loop body
LE: loop exit
PB: predicated region body
PF: predicated region fallthrough
CT: control target
= control target key end

     0   :  { %s2869_s0 = inlined_call_operand.hbm [shape: f32[2,8,32], index: 0, kind: input, shape index: {}]   ;;  %s2870_s1 = inlined_call_operand.hbm [shape: f32[2,8,32], index: 1, kind: input, shape index: {}]   ;;  %s2871_s2 = inlined_call_operand.hbm [shape: f32[2,8,32], index: 2, kind: input, shape index: {}]   ;;  %s2872_s3 = inlined_call_operand.hbm [shape: f32[32,32], index: 3, kind: input, shape index: {}]   ;;  %s2873_s4 = inlined_call_operand.hbm [shape: f32[32,32], index: 4, kind: input, shape index: {}]   ;;  %s2874_s5 = inlined_call_operand.hbm [shape: f32[32,32], index: 5, kind: input, shape index: {}]   ;;  %s2875_s6 = inlined_call_operand.hbm [shape: f32[32,32], index: 6, kind: input, shape index: {}]   ;;  %s2876_s7 = inlined_call_operand.hbm [shape: f32[2,8,32], index: 7, kind: output, shape index: {0}]   ;;  %s2877_s8 = inlined_call_operand.hbm [shape: f32[2,8,32], index: 8, kind: output, shape index: {1}]  }
   0x1   :  { %2888 = sst [smem:[#allocation32_spill]] %s2869_s0 }
   0x2   :  { %2889 = sst [smem:[#allocation33_spill]] %s2870_s1 }
   0x3   :  { %2890 = sst [smem:[#allocation34_spill]] %s2872_s3 }
   0x4   :  { %2891 = sst [smem:[#allocation35_spill]] %s2873_s4 }
   0x5   :  { %2892 = sst [smem:[#allocation36_spill]] %s2874_s5 }
   0x6   :  { %2893 = sst [smem:[#allocation37_spill]] %s2875_s6 }
   0x7   :  { %14 = vsyncpa [#allocation7], 0 }
   0x8   :  { %16 = vsyncpa [#allocation7 + $0x1], 0 }
   0x9   :  { %17 = vsyncpa [#allocation10], 0 }
   0xa   :  { %19 = vsyncpa [#allocation10 + $0x1], 0 }
   0xb   :  { %20 = vsyncpa [#allocation13], 0 }
   0xc   :  { %21 = vsyncpa [#allocation16], 0 }
   0xd   :  { %22 = vsyncpa [#allocation8], 0 }
   0xe   :  { %24 = vsyncpa [#allocation8 + $0x1], 0 }
   0xf   :  { %25 = vsyncpa [#allocation20], 0 }
  0x10   :  { %27 = vsyncpa [#allocation20 + $0x1], 0  ;;  %s2400_s27 = smov 0   ;;  %s2402_s28 = smov 0  }
  0x11   :  { %s2404_s29 = smov 0   ;;  %s2406_s30 = smov 0  }
  0x12   :  { %s2408_s9 = smov 0   ;;  %s2410_s10 = smov 0  }
  0x13 LB: > { %2894 = sst [smem:[#allocation27_spill]] %s2332_s9  ;;  %s2431_s11 = sadd.s32 4294967295, %s2336_s10   ;;  %s2336_s10 = sphi %s2410_s10, %s33_s10   ;;  %s2332_s9 = sphi %s2408_s9, %s2919_s9   ;;  %s2328_s30 = sphi %s2406_s30, %s2918_s30   ;;  %s2324_s29 = sphi %s2404_s29, %s2922_s29   ;;  %s2320_s28 = sphi %s2402_s28, %s2921_s28   ;;  %s2316_s27 = sphi %s2400_s27, %s2920_s27  }
  0x14   : > { %2895 = sst [smem:[#allocation28_spill]] %s2336_s10  ;;  %p1798_p0 = scmp.ge.s32.totalorder %s2336_s10, 1 }
  0x15   : > { %p75_p1 = scmp.eq.s32.totalorder %s2431_s11, 0  ;;  %p281_p2 = scmp.lt.s32.totalorder %s2336_s10, 3 }
  0x16   : > { %s2896_s3 = sld [smem:[#allocation34_spill]]  ;;  %s2338_s16 = smov [#allocation12]  }
  0x17   : > { %p2439_p3 = pnand %p1798_p0, %p281_p2  ;;  %s294_s17 = sshll.u32 %s2338_s16, 4  ;;  %s295_s17 = int_to_ptr.vmem [resolvable:$true] %s294_s17 }
  0x18   : > { %p1803_p6 = scmp.ge.s32.totalorder %s2336_s10, 2  ;;  %s2899_s5 = sld [smem:[#allocation36_spill]] }
  0x19   : > { %p1868_p4 = pneg %p2439_p3  ;;  %s2878_s22 = smov 128  }
  0x1a   : > { %s2880_s23 = smov 8   ;;  %s2341_s24 = smov [#allocation15]  }
  0x1b   : > { %p2447_p5 = pnand %p1868_p4, %p75_p1  ;;  %s322_s25 = sshll.u32 %s2341_s24, 4  ;;  %s323_s25 = int_to_ptr.vmem [resolvable:$true] %s322_s25 }
  0x1c   : > { %s292_s14 = sshll.u32 %s2896_s3, 4  ;;  %s1797_s26 = sadd.s32 4294967294, %s2336_s10   ;;  %s293_s14 = int_to_ptr.hbm [resolvable:$true] %s292_s14 }
  0x1d   : > { %1871 = dma.hbm_to_vmem [thread:$0]  (!%p2447_p5), %s293_s14, 512, %s295_s17, [#allocation13], %s2878_s22, %s2878_s22, %s2880_s23  }
  0x1e   : > { %s320_s21 = sshll.u32 %s2899_s5, 4  ;;  %s52_s12 = sadd.s32 1, %s2332_s9  ;;  %s321_s21 = int_to_ptr.hbm [resolvable:$true] %s320_s21 }
  0x1f   : > { %1877 = dma.hbm_to_vmem [thread:$0]  (!%p2447_p5), %s321_s21, 512, %s323_s25, [#allocation16], %s2878_s22, %s2878_s22, %s2880_s23  }
  0x20   : > { %p54_p7 = scmp.ge.s32.totalorder %s52_s12, 2  ;;  %s61_s13 = sadd.s32 1, %s2324_s29 }
  0x21   : > { %p68_p8 = scmp.ne.s32.totalorder %s2324_s29, %s2320_s28  ;;  %p69_p9 = scmp.eq.s32.totalorder %s2336_s10, 0 }
  0x22   : > { %s2924_s12 = smov (%p54_p7, %s52_s12), 0  ;;  %p74_p11 = scmp.ne.s32.totalorder %s2320_s28, %s2316_s27 }
  0x23   : > { %2900 = sst [smem:[#allocation29_spill]] %s2924_s12  ;;  %p2473_p10 = por %p69_p9, %p68_p8 }
  0x24   : > { %s56_s16 = ssub.s32 %s2332_s9, %s2924_s12  ;;  %p240_p12 = scmp.eq.s32.totalorder %s2431_s11, 1 }
  0x25   : > { %p59_p13 = scmp.eq.s32.totalorder %s56_s16, 0  ;;  %p2484_p0 = por %p75_p1, %p74_p11 }
  0x26   : > { %p2488_p2 = por %p240_p12, %p68_p8  ;;  %p246_p4 = scmp.eq.s32.totalorder %s1797_s26, 1 }
  0x27   : > { %s2493_s20 = scalar_select %p59_p13, %s2324_s29, %s61_s13  }
  0x28   : > { %p2495_p7 = por %p246_p4, %p74_p11  ;;  %p1902_p9 = scmp.lt.s32.totalorder %s2336_s10, 2 }
  0x29   : > { %2904 = sst [smem:[#allocation30_spill]] %s2493_s20  ;;  %s2884_s24 = sand.u32 1, %s2324_s29  }
  0x2a   : > { %s2905_s21 = scalar_select %p2495_p7, 1, 0 }
  0x2b   : > { %s2502_s25 = sshll.u32 %s2332_s9, 3  ;;  %s2506_s16 = sshll.u32 %s2884_s24, 3 }
  0x2c   : > { %2906 = sst [smem:[#allocation31_spill]] %s2905_s21  ;;  %p2510_p8 = pnand %p1902_p9, %p2473_p10 }
  0x2d   : > { %s370_s26 = sand.u32 1, %s2336_s10   ;;  %s2908_s1 = sld [smem:[#allocation33_spill]] }
  0x2e   : > { %s374_s5 = scalar_lea.vmem [#allocation9], %s2506_s16  ;;  %s2909_s4 = sld [smem:[#allocation35_spill]] }
  0x2f   : > { %s383_s12 = sshll.u32 %s374_s5, 4  ;;  %s371_s21 = scalar_lea.sflag [#allocation10], %s370_s26  ;;  %s384_s12 = int_to_ptr.vmem [resolvable:$true] %s383_s12 }
  0x30   : > { %s2342_s10 = smov [#allocation14]   ;;  %s2910_s6 = sld [smem:[#allocation37_spill]] }
  0x31   : > { %s308_s23 = sshll.u32 %s2342_s10, 4  ;;  %s2911_s5 = smov 8   ;;  %s309_s23 = int_to_ptr.vmem [resolvable:$true] %s308_s23 }
  0x32   : > { %s2912_s24 = smov 128   ;;  %s2343_s26 = smov [#allocation17]  }
  0x33   : > { %s379_s3 = scalar_lea.hbm %s2908_s1, %s2502_s25  ;;  %s2913_s0 = sld [smem:[#allocation32_spill]] }
  0x34   : > { %s381_s9 = sshll.u32 %s379_s3, 4  ;;  %s306_s20 = sshll.u32 %s2909_s4, 4  ;;  %s382_s9 = int_to_ptr.hbm [resolvable:$true] %s381_s9  ;;  %s307_s20 = int_to_ptr.hbm [resolvable:$true] %s306_s20 }
  0x35   : > { %1887 = dma.hbm_to_vmem [thread:$0]  (!%p2510_p8), %s382_s9, 128, %s384_s12, %s371_s21  }
  0x36   : > { %s334_s3 = sshll.u32 %s2910_s6, 4  ;;  %s336_s9 = sshll.u32 %s2343_s26, 4  ;;  %s335_s3 = int_to_ptr.hbm [resolvable:$true] %s334_s3  ;;  %s337_s9 = int_to_ptr.vmem [resolvable:$true] %s336_s9 }
  0x37   : > { %1874 = dma.hbm_to_vmem [thread:$0]  (!%p2447_p5), %s307_s20, 512, %s309_s23, [#allocation13], %s2912_s24, %s2912_s24, %s2911_s5  }
  0x38   : > { %1880 = dma.hbm_to_vmem [thread:$0]  (!%p2447_p5), %s335_s3, 512, %s337_s9, [#allocation16], %s2912_s24, %s2912_s24, %s2911_s5  }
  0x39   : > { %s359_s10 = scalar_lea.hbm %s2913_s0, %s2502_s25  ;;  %s354_s13 = scalar_lea.vmem [#allocation6], %s2506_s16 }
  0x3a   : > { %s361_s1 = sshll.u32 %s359_s10, 4  ;;  %s363_s4 = sshll.u32 %s354_s13, 4  ;;  %s362_s1 = int_to_ptr.hbm [resolvable:$true] %s361_s1  ;;  %s364_s4 = int_to_ptr.vmem [resolvable:$true] %s363_s4 }
  0x3b   : > { %s2914_s6 = sand.u32 1, %s2324_s29   ;;  %s399_s12 = scalar_lea.hbm %s2871_s2, %s2502_s25 }
  0x3c   : > { %s351_s20 = scalar_lea.sflag [#allocation7], %s2914_s6  ;;  %s401_s14 = sshll.u32 %s399_s12, 4  ;;  %s402_s14 = int_to_ptr.hbm [resolvable:$true] %s401_s14 }
  0x3d   : > { %1884 = dma.hbm_to_vmem [thread:$0]  (!%p2510_p8), %s362_s1, 128, %s364_s4, %s351_s20  }
  0x3e   : > { %s394_s0 = scalar_lea.vmem [#allocation11], %s2506_s16  ;;  %412 = sbr.rel (%p2439_p3) target bundleno = 1291 (0x50b), region = 48 }
  0x3f   : > { %s403_s18 = sshll.u32 %s394_s0, 4  ;;  %s2557_s3 = sand.u32 (!%p2439_p3), 1, %s2320_s28   ;;  %s404_s18 = int_to_ptr.vmem [resolvable:$true] %s403_s18 }
  0x40   : > { %1890 = dma.hbm_to_vmem [thread:$0]  (!%p2510_p8), %s402_s14, 128, %s404_s18, %s371_s21  }
  0x41   : > { %s2560_s4 = sshll.u32 (!%p2439_p3), %s2557_s3, 3  ;;  %s415_s6 = scalar_lea.sflag (!%p2439_p3), [#allocation7], %s2557_s3 }
  0x42   : > { %s418_s25 = scalar_lea.vmem (!%p2439_p3), [#allocation6], %s2560_s4 }
  0x43   : > { %2291 = dma.done.wait (%p2484_p0), %s415_s6, 128  }
  0x44   : > { %2293 = vsyncadd (%p2484_p0), %s415_s6, 4294967168  ;;  %s424_s0 = sand.u32 1, %s2431_s11   ;;  %s428_s22 = scalar_lea.vmem [#allocation9], %s2560_s4 }
  0x45   : > { %s425_s15 = scalar_lea.sflag [#allocation10], %s424_s0 }
  0x46   : > { %2295 = dma.done.wait (%p2484_p0), %s425_s15, 256  }
  0x47   : > { %2297 = vsyncadd (%p2484_p0), %s425_s15, 4294967040  ;;  %s438_s21 = scalar_lea.vmem [#allocation11], %s2560_s4 }
  0x48   : > { %2299 = dma.done.wait (%p75_p1), [#allocation13], 1024  }
  0x49   : > { %2301 = vsyncadd (%p75_p1), [#allocation13], 4294966272 }
  0x4a   : > { %2303 = dma.done.wait (%p75_p1), [#allocation16], 1024  }
  0x4b   : > { %2305 = vsyncadd (%p75_p1), [#allocation16], 4294966272  ;;  %v515_v0 = vld [vmem:[#allocation12 + $0x18] sm:$0xff]  ;;  %v514_v2 = vld [vmem:[#allocation12 + $0x10] sm:$0xff]  ;;  %vm516_vm0 = vcmask 261120   ;;  %s2344_s11 = smov 112  }
  0x4c   : > { %v685_v1 = vld [vmem:[#allocation14 + $0x18] sm:$0xff]  ;;  %532 = vmatpush.msra.mxu0 %v515_v0  ;;  %v684_v3 = vld [vmem:[#allocation14 + $0x10] sm:$0xff]  ;;  %v513_v4 = vld [vmem:[#allocation12 + $0x8] sm:$0xff]  ;;  %s2345_s17 = smov 104   ;;  %s2346_s16 = smov 120   ;;  %vm552_vm1 = vcmask 1047556  }
  0x4d   : > { %702 = vmatpush.msra.mxu1 %v685_v1  ;;  %v683_v5 = vld [vmem:[#allocation14 + $0x8] sm:$0xff]  ;;  %v713_v6 = vld [vmem:[#allocation15 + $0x18] sm:$0xff]  ;;  %v712_v7 = vld [vmem:[#allocation15 + $0x10] sm:$0xff]  ;;  %v2347_v20 = vmov 1983009808   ;;  %vm662_vm2 = vcmask 64512  }
  0x4e   : > { %533 = vmatpush.msra.mxu0 %v514_v2  ;;  %v512_v8 = vld [vmem:[#allocation12] sm:$0xff]  ;;  %729 = vmatpush.msra.mxu2 %v713_v6  ;;  %v511_v10 = vld [vmem:[%s418_s25] sm:$0xff]  ;;  %v711_v12 = vld [vmem:[#allocation15 + $0x8] sm:$0xff]  ;;  %v557_v21 = vunpack.c.l.s4 %v2347_v20  ;;  %v2348_v34 = vmov 1934713408   ;;  %vm667_vm3 = vcmask 7168  }
  0x4f   : > { %703 = vmatpush.msra.mxu1 %v684_v3  ;;  %v682_v9 = vld [vmem:[#allocation14] sm:$0xff]  ;;  %v681_v14 = vld [vmem:[%s438_s21] sm:$0xff]  ;;  %v581_v35 = vunpack.c.l.s4 %v2348_v34  ;;  %s2352_s5 = smov 24   ;;  %s2353_s24 = smov 16  }
  0x50   : > { %534 = vmatpush.msra.mxu0 %v513_v4  ;;  %v680_v11 = vld [vmem:[%s428_s22] sm:$0xff]  ;;  %730 = vmatpush.msra.mxu2 %v712_v7  ;;  %v2593_v28 = vunpack.c.0.s8 %v557_v21  ;;  %s2354_s9 = smov 8   ;;  %s506_s10 = scalar_lea.vmem [#allocation19], %s2560_s4 }
  0x51   : > { %704 = vmatpush.msra.mxu1 %v683_v5  ;;  %v710_v13 = vld [vmem:[#allocation15] sm:$0xff]  ;;  %v2603_v42 = vunpack.c.0.s8 %v581_v35  ;;  %s1838_s1 = sshll.u32 %s2328_s30, 3  ;;  %s1593_s26 = sshll.u32 %s506_s10, 4  ;;  %s1594_s26 = int_to_ptr.vmem [resolvable:$true] %s1593_s26 }
  0x52   : > { %535 = vmatpush.msra.mxu0 %v512_v8  ;;  %731 = vmatpush.msra.mxu2 %v711_v12  ;;  %s1591_s23 = scalar_lea.hbm %s2877_s8, %s1838_s1  ;;  %s1565_s14 = scalar_lea.sflag [#allocation20], %s2557_s3 }
  0x53   : > { %705 = vmatpush.msra.mxu1 %v682_v9  ;;  %1820 = vmatmul.msk.f32.vlgmr.msra.gmra.mxu0 %vm516_vm0, %v511_v10  ;;  %s1595_s12 = sshll.u32 %s1591_s23, 4  ;;  %s2230_s30 = scalar_lea.hbm %s2877_s8, 16  ;;  %s1596_s12 = int_to_ptr.hbm [resolvable:$true] %s1595_s12 }
  0x54   : > { %1821 = vmatmul.msk.f32.vlgmr.msra.gmra.mxu1 %vm516_vm0, %v680_v11  ;;  %732 = vmatpush.msra.mxu2 %v710_v13  ;;  %s2224_s18 = sshra.s32 %s1596_s12, 4  ;;  %s2225_s18 = int_to_ptr.hbm [resolvable:$true] %s2224_s18 }
  0x55   : > { %1822 = vmatmul.msk.f32.vlgmr.msra.gmra.mxu2 %vm516_vm0, %v681_v14  ;;  %s2226_s6 = scalar_lea.hbm %s2225_s18, 8  ;;  %p2231_p10 = scmp.lt.s32.totalorder %s2225_s18, %s2877_s8 }
  0x56   : > { %p2227_p1 = scmp.ne.s32.totalorder %s2225_s18, %s2226_s6  ;;  %p2232_p11 = scmp.lt.s32.totalorder %s2230_s30, %s2226_s6 }
  0x58   : > { %p2228_p3 = pnand %p2227_p1, %p2488_p2  ;;  %p2233_p12 = por %p2232_p11, %p2231_p10 }
  0x5a   : > { %p2229_p5 = pneg %p2228_p3 }
  0x5c   : > { %p2234_p13 = pnand %p2233_p12, %p2229_p5 }
  0xd0   : > { %v537_v15 = vpop.f32.mrf.mxu0 }
  0xd1   : > { %v707_v16 = vpop.f32.mrf.mxu1  ;;  %v540_v17 = vmul.f32 0.35355338, %v537_v15 }
  0xd2   : > { %741 = vrot.lane.b32.xlu2 %v707_v16, %s2344_s11  ;;  %v750_v25 = vrot.slane %v707_v16, 4 }
  0xd3   : > { %548 = vrot.lane.b32.xlu1 %v540_v17, %s2345_s17  ;;  %542 = vrot.lane.b32.xlu0 %v540_v17, %s2346_s16  ;;  %v554_v41 = vrot.slane %v540_v17, 4 }
  0xd8   : > { %v2588_v18 = vpop.f32.mrf.mxu2 }
  0xda   : > { %744 = vrot.lane.b32.xlu2 %v707_v16, %s2345_s17 }
  0xdb   : > { %738 = vrot.lane.b32.xlu1 %v707_v16, %s2346_s16  ;;  %545 = vrot.lane.b32.xlu0 %v540_v17, %s2344_s11 }
  0xe2   : > { %865 = vrot.lane.b32.xlu2 %v2588_v18, %s2345_s17 }
  0xe3   : > { %862 = vrot.lane.b32.xlu1 %v2588_v18, %s2344_s11  ;;  %859 = vrot.lane.b32.xlu0 %v2588_v18, %s2346_s16 }
 0x12c   : > { %v742_v19 = vpop.permute.xlu2 %741 }
 0x12d   : > { %v747_v22 = vrot.slane %v742_v19, 4  ;;  %v751_v30 = vsel %vm552_vm1, %v742_v19, %v750_v25 }
 0x12e   : > { %v759_v37 = vperm.slane %v751_v30, %v2593_v28 }
 0x12f   : > { %v749_v29 = vsel %vm552_vm1, %v747_v22, %v707_v16 }
 0x130   : > { %v755_v36 = vperm.slane %v749_v29, %v2593_v28  ;;  %v786_v50 = vrot.slane %v759_v37, 4 }
 0x132   : > { %v774_v49 = vrot.slane %v755_v36, 4 }
 0x134   : > { %v745_v31 = vpop.permute.xlu2 %744 }
 0x135   : > { %v760_v38 = vrot.slane %v745_v31, 4 }
 0x145   : > { %v549_v23 = vpop.permute.xlu1 %548  ;;  %v543_v24 = vpop.permute.xlu0 %542 }
 0x146   : > { %v564_v26 = vrot.slane %v549_v23, 4  ;;  %v566_v27 = vrot.slane %v543_v24, 4 }
 0x148   : > { %v565_v32 = vsel %vm552_vm1, %v564_v26, %v543_v24  ;;  %v567_v33 = vsel %vm552_vm1, %v549_v23, %v566_v27 }
 0x149   : > { %v571_v39 = vperm.slane %v565_v32, %v2593_v28  ;;  %v575_v40 = vperm.slane %v567_v33, %v2593_v28 }
 0x14b   : > { %v576_v53 = vrot.slane %v571_v39, 4  ;;  %v588_v54 = vrot.slane %v575_v40, 4 }
 0x14d   : > { %v739_v43 = vpop.permute.xlu1 %738  ;;  %v546_v44 = vpop.permute.xlu0 %545 }
 0x14e   : > { %v761_v45 = vsel %vm552_vm1, %v760_v38, %v739_v43  ;;  %v762_v46 = vrot.slane %v739_v43, 4  ;;  %v551_v47 = vrot.slane %v546_v44, 4  ;;  %v555_v48 = vsel %vm552_vm1, %v546_v44, %v554_v41 }
 0x14f   : > { %v767_v51 = vperm.slane %v761_v45, %v2593_v28  ;;  %v563_v52 = vperm.slane %v555_v48, %v2593_v28 }
 0x150   : > { %v763_v55 = vsel %vm552_vm1, %v745_v31, %v762_v46  ;;  %v553_v56 = vsel %vm552_vm1, %v551_v47, %v540_v17 }
 0x151   : > { %v771_v57 = vperm.slane %v763_v55, %v2593_v28  ;;  %v772_v58 = vrot.slane %v767_v51, 4  ;;  %v775_v59 = vsel %vm552_vm1, %v767_v51, %v774_v49  ;;  %v559_v60 = vperm.slane %v553_v56, %v2593_v28 }
 0x152   : > { %v783_v61 = vperm.slane %v775_v59, %v2603_v42  ;;  %v589_v62 = vsel %vm552_vm1, %v588_v54, %v563_v52  ;;  %v590_v63 = vrot.slane %v563_v52, 4 }
 0x153   : > { %v773_v0 = vsel %vm552_vm1, %v772_v58, %v755_v36  ;;  %v784_v1 = vrot.slane %v771_v57, 4  ;;  %v787_v2 = vsel %vm552_vm1, %v771_v57, %v786_v50  ;;  %v577_v3 = vsel %vm552_vm1, %v576_v53, %v559_v60 }
 0x154   : > { %v779_v4 = vperm.slane %v773_v0, %v2603_v42  ;;  %v795_v5 = vperm.slane %v787_v2, %v2603_v42  ;;  %v798_v6 = vrot.slane %v783_v61, 4  ;;  %v578_v7 = vrot.slane %v559_v60, 4 }
 0x155   : > { %v785_v8 = vsel %vm552_vm1, %v784_v1, %v759_v37  ;;  %v583_v9 = vperm.slane %v577_v3, %v2603_v42  ;;  %v591_v10 = vsel %vm552_vm1, %v575_v40, %v590_v63  ;;  %v595_v11 = vperm.slane %v589_v62, %v2603_v42 }
 0x156   : > { %v791_v12 = vperm.slane %v785_v8, %v2603_v42  ;;  %v796_v13 = vrot.slane %v779_v4, 4  ;;  %v799_v14 = vsel %vm552_vm1, 0.0, %v798_v6  ;;  %v802_v15 = vrot.slane %v795_v5, 4 }
 0x157   : > { %v804_v16 = vsel %vm552_vm1, %v798_v6, %v779_v4  ;;  %v809_v17 = vrot.slane %v799_v14, 4  ;;  %v579_v19 = vsel %vm552_vm1, %v571_v39, %v578_v7  ;;  %v599_v20 = vperm.slane %v591_v10, %v2603_v42 }
 0x158   : > { %v797_v21 = vsel %vm552_vm1, 0.0, %v796_v13  ;;  %v800_v22 = vrot.slane %v791_v12, 4  ;;  %v803_v23 = vsel %vm552_vm1, 0.0, %v802_v15  ;;  %v808_v24 = vperm.slane %v804_v16, %v2593_v28 }
 0x159   : > { %v820_v25 = vrot.slane %v803_v23, 4  ;;  %v587_v26 = vperm.slane %v579_v19, %v2603_v42  ;;  %v600_v27 = vrot.slane %v583_v9, 4  ;;  %v604_v29 = vrot.slane %v595_v11, 4 }
 0x15a   : > { %v606_v30 = vrot.slane %v599_v20, 4  ;;  %v801_v31 = vsel %vm552_vm1, 0.0, %v800_v22  ;;  %v810_v32 = vsel %vm552_vm1, %v809_v17, %v797_v21  ;;  %v815_v33 = vsel %vm552_vm1, %v802_v15, %v791_v12 }
 0x15b   : > { %v601_v34 = vsel %vm552_vm1, 0.0, %v600_v27  ;;  %v602_v35 = vrot.slane %v587_v26, 4  ;;  %v605_v36 = vsel %vm552_vm1, 0.0, %v604_v29  ;;  %v814_v37 = vperm.slane %v810_v32, %v2593_v28 }
 0x15c   : > { %v607_v38 = vsel %vm552_vm1, 0.0, %v606_v30  ;;  %v619_v39 = vsel %vm552_vm1, %v606_v30, %v595_v11  ;;  %v819_v40 = vperm.slane %v815_v33, %v2593_v28  ;;  %v821_v41 = vsel %vm552_vm1, %v820_v25, %v801_v31 }
 0x15d   : > { %v603_v43 = vsel %vm552_vm1, 0.0, %v602_v35  ;;  %v608_v44 = vsel %vm552_vm1, %v602_v35, %v583_v9  ;;  %v623_v45 = vperm.slane %v619_v39, %v2593_v28  ;;  %v624_v46 = vrot.slane %v607_v38, 4  ;;  %v863_v39 = vpop.permute.xlu1 %862 }
 0x15e   : > { %v612_v47 = vperm.slane %v608_v44, %v2593_v28  ;;  %v613_v48 = vrot.slane %v603_v43, 4  ;;  %v825_v49 = vperm.slane %v821_v41, %v2593_v28  ;;  %v828_v50 = vrot.slane %v808_v24, 4 }
 0x15f   : > { %v625_v51 = vsel %vm552_vm1, %v624_v46, %v605_v36  ;;  %v644_v52 = vrot.slane %v623_v45, 4  ;;  %v840_v53 = vrot.slane %v819_v40, 4  ;;  %v826_v54 = vrot.slane %v814_v37, 4  ;;  %v866_v36 = vpop.permute.xlu2 %865 }
 0x160   : > { %v614_v55 = vsel %vm552_vm1, %v613_v48, %v601_v34  ;;  %v629_v56 = vperm.slane %v625_v51, %v2593_v28  ;;  %v632_v57 = vrot.slane %v612_v47, 4  ;;  %v829_v58 = vsel %vm552_vm1, %v814_v37, %v828_v50 }
 0x161   : > { %v618_v59 = vperm.slane %v614_v55, %v2593_v28  ;;  %v837_v60 = vperm.slane %v829_v58, %v2603_v42  ;;  %v841_v61 = vsel %vm552_vm1, %v825_v49, %v840_v53  ;;  %v827_v62 = vsel %vm552_vm1, %v826_v54, %v808_v24 }
 0x162   : > { %v642_v63 = vrot.slane %v629_v56, 4  ;;  %v645_v0 = vsel %vm552_vm1, %v629_v56, %v644_v52  ;;  %v849_v1 = vperm.slane %v841_v61, %v2603_v42  ;;  %v833_v2 = vperm.slane %v827_v62, %v2603_v42 }
 0x163   : > { %v630_v3 = vrot.slane %v618_v59, 4  ;;  %v633_v4 = vsel %vm552_vm1, %v618_v59, %v632_v57  ;;  %v653_v5 = vperm.slane %v645_v0, %v2603_v42  ;;  %v856_v6 = vrot.slane %v837_v60, 4 }
 0x164   : > { %v641_v7 = vperm.slane %v633_v4, %v2603_v42  ;;  %v643_v8 = vsel %vm552_vm1, %v642_v63, %v623_v45  ;;  %v854_v9 = vrot.slane %v849_v1, 4  ;;  %v838_v10 = vrot.slane %v825_v49, 4 }
 0x165   : > { %v631_v11 = vsel %vm552_vm1, %v630_v3, %v612_v47  ;;  %v649_v12 = vperm.slane %v643_v8, %v2603_v42  ;;  %v658_v13 = vrot.slane %v653_v5, 4  ;;  %v857_v14 = vsel %vm552_vm1, %v849_v1, %v856_v6 }
 0x166   : > { %v637_v15 = vperm.slane %v631_v11, %v2603_v42  ;;  %v660_v16 = vrot.slane %v641_v7, 4  ;;  %1829 = vmatpush.xpose.msk.msrb.mxu1 %vm662_vm2, %v857_v14  ;;  %v855_v17 = vsel %vm552_vm1, %v854_v9, %v837_v60  ;;  %v839_v19 = vsel %vm552_vm1, %v838_v10, %v819_v40  ;;  %v860_v40 = vpop.permute.xlu0 %859 }
 0x167   : > { %v654_v20 = vrot.slane %v649_v12, 4  ;;  %v659_v21 = vsel %vm552_vm1, %v658_v13, %v641_v7  ;;  %1827 = vmatpush.xpose.msk.msrb.mxu0 %vm662_vm2, %v855_v17  ;;  %v845_v22 = vperm.slane %v839_v19, %v2603_v42  ;;  %v852_v25 = vrot.slane %v833_v2, 4 }
 0x168   : > { %v656_v23 = vrot.slane %v637_v15, 4  ;;  %v661_v24 = vsel %vm552_vm1, %v653_v5, %v660_v16  ;;  %665 = vst.msk [vmem:[#allocation2 + $0x10] sm:$0xff] %vm662_vm2, %v659_v21  ;;  %v870_v37 = vrot.slane %v2588_v18, 4  ;;  %v880_v38 = vrot.slane %v866_v36, 4 }
 0x169   : > { %v655_v26 = vsel %vm552_vm1, %v654_v20, %v637_v15  ;;  %666 = vst.msk [vmem:[#allocation2 + $0x18] sm:$0xff] %vm662_vm2, %v661_v24  ;;  %v850_v27 = vrot.slane %v845_v22, 4  ;;  %v853_v31 = vsel %vm552_vm1, %v845_v22, %v852_v25  ;;  %v868_v41 = vrot.slane %v863_v39, 4 }
 0x16a   : > { %v657_v29 = vsel %vm552_vm1, %v649_v12, %v656_v23  ;;  %663 = vst.msk [vmem:[#allocation2] sm:$0xff] %vm662_vm2, %v655_v26  ;;  %v871_v43 = vsel %vm552_vm1, %v863_v39, %v870_v37  ;;  %v882_v44 = vrot.slane %v860_v40, 4  ;;  %v881_v45 = vsel %vm552_vm1, %v880_v38, %v860_v40 }
 0x16b   : > { %664 = vst.msk [vmem:[#allocation2 + $0x8] sm:$0xff] %vm662_vm2, %v657_v29  ;;  %v851_v30 = vsel %vm552_vm1, %v850_v27, %v833_v2  ;;  %v879_v46 = vperm.slane %v871_v43, %v2593_v28  ;;  %v887_v47 = vperm.slane %v881_v45, %v2593_v28  ;;  %v869_v48 = vsel %vm552_vm1, %v868_v41, %v2588_v18 }
 0x16c   : > { %1823 = vmatpush.xpose.msk.msra.mxu3 %vm662_vm2, %v851_v30  ;;  %v883_v49 = vsel %vm552_vm1, %v866_v36, %v882_v44  ;;  %v875_v50 = vperm.slane %v869_v48, %v2593_v28  ;;  %v2349_v39 = vmov -inf  }
 0x16d   : > { %v906_v51 = vrot.slane %v879_v46, 4  ;;  %v891_v52 = vperm.slane %v883_v49, %v2593_v28  ;;  %v892_v53 = vrot.slane %v887_v47, 4  ;;  %670 = vst.msk [vmem:[#allocation3 + $0x10] sm:$0xff] %vm667_vm3, %v2349_v39  ;;  %v2350_v49 = vmov 0  }
 0x16e   : > { %v894_v54 = vrot.slane %v875_v50, 4  ;;  %668 = vst.msk [vmem:[#allocation3] sm:$0xff] %vm667_vm3, %v2349_v39  ;;  %1974 = vset.pattern.permute.xlu2 %v2350_v49  ;;  %1973 = vset.pattern.permute.xlu0 %v2350_v49 }
 0x16f   : > { %v980_v32 = vld [vmem:[#allocation2 + $0x10] sm:$0xff]  ;;  %v893_v55 = vsel %vm552_vm1, %v892_v53, %v875_v50  ;;  %v904_v56 = vrot.slane %v891_v52, 4  ;;  %v907_v57 = vsel %vm552_vm1, %v891_v52, %v906_v51  ;;  %669 = vst.msk [vmem:[#allocation3 + $0x8] sm:$0xff] %vm667_vm3, %v2349_v39  ;;  %1975 = vset.pattern.permute.xlu1 %v2350_v49  ;;  %v2351_v50 = vmov 0.0  }
 0x170   : > { %1825 = vmatpush.xpose.msk.msrb.mxu3 %vm662_vm2, %v853_v31  ;;  %1828 = vmatmul.msk.f32.vlgmr.msrb.gmra.mxu0 %vm662_vm2, %v980_v32  ;;  %v981_v33 = vld [vmem:[#allocation2 + $0x18] sm:$0xff]  ;;  %v899_v58 = vperm.slane %v893_v55, %v2603_v42  ;;  %v915_v59 = vperm.slane %v907_v57, %v2603_v42  ;;  %v895_v18 = vsel %vm552_vm1, %v887_v47, %v894_v54 }
 0x171   : > { %v978_v34 = vld [vmem:[#allocation2] sm:$0xff]  ;;  %1830 = vmatmul.msk.f32.vlgmr.msrb.gmra.mxu1 %vm662_vm2, %v981_v33  ;;  %v905_v60 = vsel %vm552_vm1, %v904_v56, %v879_v46  ;;  %v903_v61 = vperm.slane %v895_v18, %v2603_v42  ;;  %671 = vst.msk [vmem:[#allocation3 + $0x18] sm:$0xff] %vm667_vm3, %v2349_v39 }
 0x172   : > { %1824 = vmatmul.msk.f32.vlgmr.msra.gmra.mxu3 %vm662_vm2, %v978_v34  ;;  %v979_v35 = vld [vmem:[#allocation2 + $0x8] sm:$0xff]  ;;  %v911_v62 = vperm.slane %v905_v60, %v2603_v42  ;;  %v916_v63 = vrot.slane %v899_v58, 4  ;;  %v922_v0 = vrot.slane %v915_v59, 4  ;;  %674 = vst.msk [vmem:[#allocation4 + $0x10] sm:$0xff] %vm667_vm3, %v2351_v50 }
 0x173   : > { %v918_v1 = vrot.slane %v903_v61, 4  ;;  %672 = vst.msk [vmem:[#allocation4] sm:$0xff] %vm667_vm3, %v2351_v50 }
 0x174   : > { %v920_v2 = vrot.slane %v911_v62, 4  ;;  %v923_v3 = vsel %vm552_vm1, 0.0, %v922_v0  ;;  %v935_v4 = vsel %vm552_vm1, %v922_v0, %v911_v62  ;;  %v917_v9 = vsel %vm552_vm1, 0.0, %v916_v63  ;;  %673 = vst.msk [vmem:[#allocation4 + $0x8] sm:$0xff] %vm667_vm3, %v2351_v50  ;;  %v1089_v51 = vld [vmem:[#allocation3 + $0x10] sm:$0xff] }
 0x175   : > { %v940_v5 = vrot.slane %v923_v3, 4  ;;  %v939_v6 = vperm.slane %v935_v4, %v2593_v28  ;;  %v919_v7 = vsel %vm552_vm1, 0.0, %v918_v1  ;;  %v924_v10 = vsel %vm552_vm1, %v918_v1, %v899_v58  ;;  %675 = vst.msk [vmem:[#allocation4 + $0x18] sm:$0xff] %vm667_vm3, %v2351_v50  ;;  %v1087_v56 = vld [vmem:[#allocation3] sm:$0xff] }
 0x176   : > { %v921_v8 = vsel %vm552_vm1, 0.0, %v920_v2  ;;  %v929_v11 = vrot.slane %v919_v7, 4  ;;  %v928_v12 = vperm.slane %v924_v10, %v2593_v28  ;;  %676 = vst.msk [vmem:[#allocation5] sm:$0xff] %vm662_vm2, %v2351_v50  ;;  %v1088_v62 = vld [vmem:[#allocation3 + $0x8] sm:$0xff] }
 0x177   : > { %v941_v13 = vsel %vm552_vm1, %v940_v5, %v921_v8  ;;  %v960_v14 = vrot.slane %v939_v6, 4  ;;  %677 = vst.msk [vmem:[#allocation5 + $0x8] sm:$0xff] %vm662_vm2, %v2351_v50 }
 0x178   : > { %v945_v15 = vperm.slane %v941_v13, %v2593_v28  ;;  %v930_v16 = vsel %vm552_vm1, %v929_v11, %v917_v9  ;;  %v948_v17 = vrot.slane %v928_v12, 4  ;;  %678 = vst.msk [vmem:[#allocation5 + $0x10] sm:$0xff] %vm662_vm2, %v2351_v50  ;;  %v1090_v55 = vld [vmem:[#allocation3 + $0x18] sm:$0xff] }
 0x179   : > { %v934_v19 = vperm.slane %v930_v16, %v2593_v28  ;;  %679 = vst.msk [vmem:[#allocation5 + $0x18] sm:$0xff] %vm662_vm2, %v2351_v50 }
 0x17a   : > { %1826 = vmatmul.msk.f32.vlgmr.msrb.gmra.mxu3 %vm662_vm2, %v979_v35  ;;  %v958_v20 = vrot.slane %v945_v15, 4  ;;  %v961_v21 = vsel %vm552_vm1, %v945_v15, %v960_v14 }
 0x17b   : > { %v969_v22 = vperm.slane %v961_v21, %v2603_v42  ;;  %v946_v23 = vrot.slane %v934_v19, 4  ;;  %v949_v25 = vsel %vm552_vm1, %v934_v19, %v948_v17 }
 0x17c   : > { %v959_v24 = vsel %vm552_vm1, %v958_v20, %v939_v6  ;;  %v957_v27 = vperm.slane %v949_v25, %v2603_v42 }
 0x17d   : > { %v965_v26 = vperm.slane %v959_v24, %v2603_v42  ;;  %v974_v29 = vrot.slane %v969_v22, 4  ;;  %v947_v30 = vsel %vm552_vm1, %v946_v23, %v928_v12 }
 0x17e   : > { %v953_v31 = vperm.slane %v947_v30, %v2603_v42  ;;  %v976_v34 = vrot.slane %v957_v27, 4 }
 0x17f   : > { %v970_v32 = vrot.slane %v965_v26, 4  ;;  %v975_v33 = vsel %vm552_vm1, %v974_v29, %v957_v27 }
 0x180   : > { %1272 = vmatpush.msra.mxu0 %v975_v33  ;;  %v972_v36 = vrot.slane %v953_v31, 4  ;;  %v977_v37 = vsel %vm552_vm1, %v969_v22, %v976_v34 }
 0x181   : > { %v971_v35 = vsel %vm552_vm1, %v970_v32, %v953_v31  ;;  %1295 = vmatpush.msra.mxu1 %v977_v37  ;;  %v1153_v32 = vld [vmem:[#allocation4 + $0x10] sm:$0xff] }
 0x182   : > { %1226 = vmatpush.msrb.mxu2 %v971_v35  ;;  %v973_v38 = vsel %vm552_vm1, %v965_v26, %v972_v36 }
 0x183   : > { %1249 = vmatpush.msra.mxu3 %v973_v38 }
 0x1ed   : > { %v1058_v40 = vpop.f32.mrf.mxu0 }
 0x1ee   : > { %v1097_v41 = vsel %vm662_vm2, %v1058_v40, -inf  ;;  %v2736_v43 = vpop.f32.mrf.mxu1 }
 0x1ef   : > { %1098 = vmax.xlane.f32.xlu2 %v1097_v41  ;;  %v1100_v45 = vsel %vm662_vm2, %v2736_v43, -inf }
 0x1f5   : > { %v1006_v44 = vpop.f32.mrf.mxu3 }
 0x1f6   : > { %v1091_v46 = vsel %vm662_vm2, %v1006_v44, -inf }
 0x1f7   : > { %1101 = vmax.xlane.f32.xlu2 %v1100_v45  ;;  %1092 = vmax.xlane.f32.xlu0 %v1091_v46 }
 0x1fd   : > { %v1032_v47 = vpop.f32.mrf.mxu3 }
 0x1fe   : > { %v1094_v48 = vsel %vm662_vm2, %v1032_v47, -inf }
 0x1ff   : > { %1095 = vmax.xlane.f32.xlu1 %v1094_v48  ;;  %v1151_v48 = vld [vmem:[#allocation4] sm:$0xff] }
 0x262   : > { %v1099_v52 = vpop.xlane.xlu2 %1098 }
 0x263   : > { %v1105_v53 = vmax.f32 %v1089_v51, %v1099_v52  ;;  %v1152_v52 = vld [vmem:[#allocation4 + $0x8] sm:$0xff] }
 0x265   : > { %v1109_v54 = vsub.f32 %v1089_v51, %v1105_v53  ;;  %1310 = vst.msk [vmem:[#allocation3 + $0x10] sm:$0xff] %vm667_vm3, %v1105_v53  ;;  %1131 = vperm.xlu2 %1974, %v1105_v53   ;;  %v1182_v53 = vld [vmem:[#allocation5 + $0x10] sm:$0xff] }
 0x267   : > { %v1115_v21 = vmul.f32 1.442695, %v1109_v54 }
 0x26a   : > { %v1102_v57 = vpop.xlane.xlu2 %1101  ;;  %v1093_v58 = vpop.xlane.xlu0 %1092 }
 0x26b   : > { %v1106_v59 = vmax.f32 %v1090_v55, %v1102_v57  ;;  %v1103_v18 = vmax.f32 %v1087_v56, %v1093_v58 }
 0x26d   : > { %v1110_v60 = vsub.f32 %v1090_v55, %v1106_v59  ;;  %1311 = vst.msk [vmem:[#allocation3 + $0x18] sm:$0xff] %vm667_vm3, %v1106_v59  ;;  %v1107_v61 = vsub.f32 %v1087_v56, %v1103_v18  ;;  %1121 = vperm.xlu0 %1973, %v1103_v18  }
 0x26e   : > { %1308 = vst.msk [vmem:[#allocation3] sm:$0xff] %vm667_vm3, %v1103_v18 }
 0x26f   : > { %v1117_v24 = vmul.f32 1.442695, %v1110_v60  ;;  %v1111_v29 = vmul.f32 1.442695, %v1107_v61  ;;  %v1154_v61 = vld [vmem:[#allocation4 + $0x18] sm:$0xff] }
 0x272   : > { %v1096_v63 = vpop.xlane.xlu1 %1095 }
 0x273   : > { %v1104_v0 = vmax.f32 %v1088_v62, %v1096_v63 }
 0x275   : > { %v1108_v1 = vsub.f32 %v1088_v62, %v1104_v0  ;;  %1309 = vst.msk [vmem:[#allocation3 + $0x8] sm:$0xff] %vm667_vm3, %v1104_v0  ;;  %1126 = vperm.xlu1 %1975, %v1104_v0  }
 0x277   : > { %v1113_v25 = vmul.f32 1.442695, %v1108_v1 }
 0x27d   : > { %1136 = vperm.xlu1 %1975, %v1106_v59  }
 0x2bf   : > { %v1132_v2 = vpop.permute.xlu2 %1131 }
 0x2c0   : > { %v1141_v3 = vsub.f32 %v1058_v40, %v1132_v2 }
 0x2c2   : > { %v1147_v4 = vmul.f32 1.442695, %v1141_v3 }
 0x2c4   : > { %1976 = vpow2.f32 %v1147_v4  ;;  %v1181_v4 = vld [vmem:[#allocation5 + $0x8] sm:$0xff] }
 0x2ca   : > { %v1977_v5 = vpop.eup %1976 }
 0x2cb   : > { %1833 = vmatmul.msk.f32.vlgmr.msra.gmra.mxu0 %vm662_vm2, %v1977_v5  ;;  %v1165_v6 = vsel %vm662_vm2, %v1977_v5, 0.0 }
 0x2cc   : > { %1166 = vadd.xlane.f32.xlu0 %v1165_v6 }
 0x2df   : > { %v1122_v7 = vpop.permute.xlu0 %1121 }
 0x2e0   : > { %v1139_v8 = vsub.f32 %v1006_v44, %v1122_v7 }
 0x2e2   : > { %v1143_v9 = vmul.f32 1.442695, %v1139_v8 }
 0x2e4   : > { %1978 = vpow2.f32 %v1143_v9 }
 0x2e7   : > { %v1127_v10 = vpop.permute.xlu1 %1126 }
 0x2e8   : > { %v1140_v11 = vsub.f32 %v1032_v47, %v1127_v10 }
 0x2ea   : > { %v1979_v12 = vpop.eup %1978  ;;  %v1145_v13 = vmul.f32 1.442695, %v1140_v11 }
 0x2eb   : > { %1831 = vmatmul.msk.f32.vlgmr.msrb.gmra.mxu2 %vm662_vm2, %v1979_v12  ;;  %v1159_v14 = vsel %vm662_vm2, %v1979_v12, 0.0 }
 0x2ec   : > { %1980 = vpow2.f32 %v1145_v13  ;;  %1160 = vadd.xlane.f32.xlu2 %v1159_v14 }
 0x2ef   : > { %v1137_v15 = vpop.permute.xlu1 %1136 }
 0x2f0   : > { %v1142_v16 = vsub.f32 %v2736_v43, %v1137_v15  ;;  %v1183_v15 = vld [vmem:[#allocation5 + $0x18] sm:$0xff] }
 0x2f2   : > { %v1981_v17 = vpop.eup %1980  ;;  %v1149_v19 = vmul.f32 1.442695, %v1142_v16 }
 0x2f3   : > { %1832 = vmatmul.msk.f32.vlgmr.msra.gmra.mxu3 %vm662_vm2, %v1981_v17  ;;  %v1162_v20 = vsel %vm662_vm2, %v1981_v17, 0.0 }
 0x2f4   : > { %1982 = vpow2.f32 %v1149_v19  ;;  %1163 = vadd.xlane.f32.xlu0 %v1162_v20 }
 0x2f5   : > { %1984 = vpow2.f32 %v1115_v21 }
 0x2f6   : > { %1986 = vpow2.f32 %v1117_v24 }
 0x2f7   : > { %1988 = vpow2.f32 %v1113_v25 }
 0x2f8   : > { %1990 = vpow2.f32 %v1111_v29 }
 0x2fa   : > { %v1983_v22 = vpop.eup %1982 }
 0x2fb   : > { %1834 = vmatmul.msk.f32.vlgmr.msra.gmra.mxu1 %vm662_vm2, %v1983_v22  ;;  %v1168_v23 = vsel %vm662_vm2, %v1983_v22, 0.0  ;;  %v1985_v26 = vpop.eup %1984 }
 0x2fc   : > { %1169 = vadd.xlane.f32.xlu1 %v1168_v23  ;;  %v1987_v27 = vpop.eup %1986  ;;  %v1157_v33 = vmul.f32 %v1985_v26, %v1153_v32 }
 0x2fd   : > { %v1989_v30 = vpop.eup %1988  ;;  %v1158_v62 = vmul.f32 %v1987_v27, %v1154_v61 }
 0x2fe   : > { %v1991_v31 = vpop.eup %1990  ;;  %v1156_v54 = vmul.f32 %v1989_v30, %v1152_v52 }
 0x2ff   : > { %v1155_v49 = vmul.f32 %v1991_v31, %v1151_v48 }
 0x304   : > { %1196 = vperm.xlu2 %1974, %v1985_v26  }
 0x308   : > { %1201 = vperm.xlu0 %1973, %v1987_v27  }
 0x30c   : > { %1191 = vperm.xlu2 %1974, %v1989_v30  }
 0x315   : > { %1186 = vperm.xlu1 %1975, %v1991_v31  }
 0x33f   : > { %v1167_v34 = vpop.xlane.xlu0 %1166 }
 0x340   : > { %v1173_v35 = vadd.f32 %v1167_v34, %v1157_v33 }
 0x342   : > { %1178 = vst.msk [vmem:[#allocation4 + $0x10] sm:$0xff] %vm667_vm3, %v1173_v35 }
 0x348   : > { %v1274_v59 = vpop.f32.mrf.mxu0 }
 0x349   : > { %v1317_v36 = vld [vmem:[#allocation4 + $0x10] sm:$0xff] }
 0x34a   : > { %1992 = vrcp.f32 %v1317_v36  ;;  %v1358_v40 = vand.u32 2147483648, %v1317_v36  ;;  %v1356_v43 = vand.u32 2147483647, %v1317_v36  ;;  %vm1352_vm5 = vweird.f32 %v1317_v36 }
 0x34c   : > { %v1359_v45 = vor.u32 1.1754944e-38, %v1358_v40  ;;  %vm1357_vm7 = vcmp.eq.f32.partialorder %v1356_v43, 8.507059e+37 }
 0x350   : > { %v1993_v37 = vpop.eup %1992 }
 0x351   : > { %v1348_v38 = vmul.f32 %v1993_v37, %v1317_v36  ;;  %vm1353_vm4 = vweird.f32 %v1993_v37 }
 0x352   : > { %vm1354_vm6 = vmor %vm1352_vm5, %vm1353_vm4 }
 0x353   : > { %v1349_v39 = vsub.f32 1.0, %v1348_v38 }
 0x355   : > { %v1350_v41 = vmul.f32 %v1993_v37, %v1349_v39  ;;  %v1180_v39 = vld [vmem:[#allocation5] sm:$0xff] }
 0x357   : > { %v1351_v44 = vadd.f32 %v1993_v37, %v1350_v41 }
 0x359   : > { %v1355_v46 = vsel %vm1354_vm6, %v1993_v37, %v1351_v44 }
 0x35a   : > { %v1360_v47 = vsel %vm1357_vm7, %v1359_v45, %v1355_v46  ;;  %vm1526_vm7 = vcmask 130048  }
 0x35b   : > { %1391 = vperm.xlu0 %1973, %v1360_v47  }
 0x35f   : > { %v1161_v50 = vpop.xlane.xlu2 %1160 }
 0x360   : > { %v1171_v51 = vadd.f32 %v1161_v50, %v1155_v49 }
 0x362   : > { %1176 = vst.msk [vmem:[#allocation4] sm:$0xff] %vm667_vm3, %v1171_v51 }
 0x367   : > { %v1197_v55 = vpop.permute.xlu2 %1196  ;;  %v1164_v56 = vpop.xlane.xlu0 %1163 }
 0x368   : > { %v1206_v57 = vmul.f32 %v1197_v55, %v1182_v53  ;;  %v1172_v58 = vadd.f32 %v1164_v56, %v1156_v54 }
 0x369   : > { %v1315_v18 = vld [vmem:[#allocation4] sm:$0xff] }
 0x36a   : > { %v1302_v60 = vadd.f32 %v1274_v59, %v1206_v57  ;;  %1177 = vst.msk [vmem:[#allocation4 + $0x8] sm:$0xff] %vm667_vm3, %v1172_v58  ;;  %1994 = vrcp.f32 %v1315_v18  ;;  %v1330_v7 = vand.u32 2147483648, %v1315_v18  ;;  %v1328_v10 = vand.u32 2147483647, %v1315_v18 }
 0x36b   : > { %vm1324_vm9 = vweird.f32 %v1315_v18 }
 0x36c   : > { %1306 = vst.msk [vmem:[#allocation5 + $0x10] sm:$0xff] %vm662_vm2, %v1302_v60  ;;  %v1331_v16 = vor.u32 1.1754944e-38, %v1330_v7  ;;  %vm1329_vm11 = vcmp.eq.f32.partialorder %v1328_v10, 8.507059e+37 }
 0x36e   : > { %v1228_v47 = vpop.f32.mrf.mxu2 }
 0x36f   : > { %v1170_v63 = vpop.xlane.xlu1 %1169  ;;  %v1192_v5 = vpop.permute.xlu2 %1191 }
 0x370   : > { %v1995_v0 = vpop.eup %1994  ;;  %v1174_v1 = vadd.f32 %v1170_v63, %v1158_v62  ;;  %v1205_v8 = vmul.f32 %v1192_v5, %v1181_v4 }
 0x371   : > { %v1320_v2 = vmul.f32 %v1995_v0, %v1315_v18  ;;  %v1316_v3 = vld [vmem:[#allocation4 + $0x8] sm:$0xff]  ;;  %vm1325_vm8 = vweird.f32 %v1995_v0 }
 0x372   : > { %1179 = vst.msk [vmem:[#allocation4 + $0x18] sm:$0xff] %vm667_vm3, %v1174_v1  ;;  %1996 = vrcp.f32 %v1316_v3  ;;  %vm1326_vm10 = vmor %vm1324_vm9, %vm1325_vm8  ;;  %v1344_v26 = vand.u32 2147483648, %v1316_v3  ;;  %v1342_v30 = vand.u32 2147483647, %v1316_v3  ;;  %vm1338_vm13 = vweird.f32 %v1316_v3 }
 0x373   : > { %v1321_v6 = vsub.f32 1.0, %v1320_v2  ;;  %v1377_v52 = vld [vmem:[#allocation5 + $0x10] sm:$0xff]  ;;  %vm1528_vm8 = vcmask 195584  }
 0x374   : > { %v1345_v33 = vor.u32 1.1754944e-38, %v1344_v26  ;;  %vm1343_vm15 = vcmp.eq.f32.partialorder %v1342_v30, 8.507059e+37 }
 0x375   : > { %v1322_v9 = vmul.f32 %v1995_v0, %v1321_v6 }
 0x376   : > { %v1251_v11 = vpop.f32.mrf.mxu3 }
 0x377   : > { %v1301_v12 = vadd.f32 %v1251_v11, %v1205_v8  ;;  %v1323_v13 = vadd.f32 %v1995_v0, %v1322_v9 }
 0x378   : > { %v1997_v14 = vpop.eup %1996  ;;  %v1297_v25 = vpop.f32.mrf.mxu1 }
 0x379   : > { %1305 = vst.msk [vmem:[#allocation5 + $0x8] sm:$0xff] %vm662_vm2, %v1301_v12  ;;  %v1327_v17 = vsel %vm1326_vm10, %v1995_v0, %v1323_v13  ;;  %v1334_v19 = vmul.f32 %v1997_v14, %v1316_v3  ;;  %v1318_v20 = vld [vmem:[#allocation4 + $0x18] sm:$0xff]  ;;  %vm1339_vm12 = vweird.f32 %v1997_v14 }
 0x37a   : > { %v1202_v21 = vpop.permute.xlu0 %1201  ;;  %v1332_v22 = vsel %vm1329_vm11, %v1331_v16, %v1327_v17  ;;  %1998 = vrcp.f32 %v1318_v20  ;;  %vm1340_vm14 = vmor %vm1338_vm13, %vm1339_vm12  ;;  %v1372_v38 = vand.u32 2147483648, %v1318_v20  ;;  %v1370_v41 = vand.u32 2147483647, %v1318_v20 }
 0x37b   : > { %v1207_v23 = vmul.f32 %v1202_v21, %v1183_v15  ;;  %1381 = vperm.xlu1 %1975, %v1332_v22   ;;  %v1335_v24 = vsub.f32 1.0, %v1334_v19  ;;  %vm1366_vm4 = vweird.f32 %v1318_v20 }
 0x37c   : > { %v1373_v46 = vor.u32 1.1754944e-38, %v1372_v38  ;;  %vm1371_vm6 = vcmp.eq.f32.partialorder %v1370_v41, 8.507059e+37 }
 0x37d   : > { %v1303_v27 = vadd.f32 %v1297_v25, %v1207_v23  ;;  %v1336_v29 = vmul.f32 %v1997_v14, %v1335_v24 }
 0x37f   : > { %1307 = vst.msk [vmem:[#allocation5 + $0x18] sm:$0xff] %vm662_vm2, %v1303_v27  ;;  %v1337_v31 = vadd.f32 %v1997_v14, %v1336_v29 }
 0x380   : > { %v1999_v32 = vpop.eup %1998  ;;  %v1376_v0 = vld [vmem:[#allocation5 + $0x8] sm:$0xff] }
 0x381   : > { %v1341_v34 = vsel %vm1340_vm14, %v1997_v14, %v1337_v31  ;;  %v1362_v35 = vmul.f32 %v1999_v32, %v1318_v20  ;;  %vm1367_vm3 = vweird.f32 %v1999_v32 }
 0x382   : > { %v1346_v36 = vsel %vm1343_vm15, %v1345_v33, %v1341_v34  ;;  %vm1368_vm5 = vmor %vm1366_vm4, %vm1367_vm3 }
 0x383   : > { %1386 = vperm.xlu0 %1973, %v1346_v36   ;;  %v1363_v37 = vsub.f32 1.0, %v1362_v35 }
 0x385   : > { %v1364_v40 = vmul.f32 %v1999_v32, %v1363_v37 }
 0x386   : > { %v1378_v18 = vld [vmem:[#allocation5 + $0x18] sm:$0xff] }
 0x387   : > { %v1187_v43 = vpop.permute.xlu1 %1186  ;;  %v1365_v44 = vadd.f32 %v1999_v32, %v1364_v40 }
 0x388   : > { %v1204_v45 = vmul.f32 %v1187_v43, %v1180_v39 }
 0x389   : > { %v1369_v48 = vsel %vm1368_vm5, %v1999_v32, %v1365_v44 }
 0x38a   : > { %v1300_v49 = vadd.f32 %v1228_v47, %v1204_v45  ;;  %v1374_v50 = vsel %vm1371_vm6, %v1373_v46, %v1369_v48 }
 0x38b   : > { %1396 = vperm.xlu2 %1974, %v1374_v50  }
 0x38c   : > { %1304 = vst.msk [vmem:[#allocation5] sm:$0xff] %vm662_vm2, %v1300_v49 }
 0x393   : > { %v1375_v54 = vld [vmem:[#allocation5] sm:$0xff] }
 0x3cd   : > { %v1392_v51 = vpop.permute.xlu0 %1391 }
 0x3ce   : > { %v1401_v53 = vmul.f32 %v1392_v51, %v1377_v52 }
 0x3d0   : > { %v1403_v58 = vrot.slane %v1401_v53, 4 }
 0x3e5   : > { %v1397_v57 = vpop.permute.xlu2 %1396 }
 0x3e6   : > { %v1402_v60 = vmul.f32 %v1397_v57, %v1378_v18 }
 0x3e8   : > { %v1415_v2 = vrot.slane %v1402_v60, 4 }
 0x3ed   : > { %v1382_v55 = vpop.permute.xlu1 %1381 }
 0x3ee   : > { %v1399_v56 = vmul.f32 %v1382_v55, %v1375_v54 }
 0x3f0   : > { %v1405_v59 = vrot.slane %v1399_v56, 4  ;;  %v1404_v61 = vsel %vm552_vm1, %v1403_v58, %v1399_v56 }
 0x3f1   : > { %v1410_v63 = vperm.slane %v1404_v61, %v2593_v28  ;;  %v1534_v61 = vld [vmem:[#allocation17 + $0x18] sm:$0xff] }
 0x3f2   : > { %v1406_v62 = vsel %vm552_vm1, %v1401_v53, %v1405_v59  ;;  %1550 = vmatpush.msra.mxu2 %v1534_v61 }
 0x3f3   : > { %v1414_v4 = vperm.slane %v1406_v62, %v2593_v28  ;;  %v1429_v7 = vrot.slane %v1410_v63, 4  ;;  %v1533_v62 = vld [vmem:[#allocation17 + $0x10] sm:$0xff] }
 0x3f4   : > { %1551 = vmatpush.msra.mxu2 %v1533_v62 }
 0x3f5   : > { %v1387_v1 = vpop.permute.xlu0 %1386  ;;  %v1441_v10 = vrot.slane %v1414_v4, 4 }
 0x3f6   : > { %v1400_v3 = vmul.f32 %v1387_v1, %v1376_v0 }
 0x3f8   : > { %v1416_v5 = vsel %vm552_vm1, %v1415_v2, %v1400_v3  ;;  %v1417_v6 = vrot.slane %v1400_v3, 4 }
 0x3f9   : > { %v1422_v8 = vperm.slane %v1416_v5, %v2593_v28 }
 0x3fa   : > { %v1418_v9 = vsel %vm552_vm1, %v1402_v60, %v1417_v6 }
 0x3fb   : > { %v1426_v11 = vperm.slane %v1418_v9, %v2593_v28  ;;  %v1427_v12 = vrot.slane %v1422_v8, 4  ;;  %v1430_v13 = vsel %vm552_vm1, %v1422_v8, %v1429_v7 }
 0x3fc   : > { %v1438_v14 = vperm.slane %v1430_v13, %v2603_v42 }
 0x3fd   : > { %v1428_v15 = vsel %vm552_vm1, %v1427_v12, %v1410_v63  ;;  %v1439_v16 = vrot.slane %v1426_v11, 4  ;;  %v1442_v17 = vsel %vm552_vm1, %v1426_v11, %v1441_v10  ;;  %v1531_v63 = vld [vmem:[#allocation17] sm:$0xff] }
 0x3fe   : > { %v1434_v19 = vperm.slane %v1428_v15, %v2603_v42  ;;  %v1450_v20 = vperm.slane %v1442_v17, %v2603_v42  ;;  %v1453_v21 = vrot.slane %v1438_v14, 4 }
 0x3ff   : > { %v1440_v22 = vsel %vm552_vm1, %v1439_v16, %v1414_v4 }
 0x400   : > { %v1446_v23 = vperm.slane %v1440_v22, %v2603_v42  ;;  %v1451_v24 = vrot.slane %v1434_v19, 4  ;;  %v1454_v25 = vsel %vm552_vm1, 0.0, %v1453_v21  ;;  %v1457_v26 = vrot.slane %v1450_v20, 4 }
 0x401   : > { %v1459_v27 = vsel %vm552_vm1, %v1453_v21, %v1434_v19  ;;  %v1464_v29 = vrot.slane %v1454_v25, 4 }
 0x402   : > { %v1458_v30 = vsel %vm552_vm1, 0.0, %v1457_v26  ;;  %v1452_v31 = vsel %vm552_vm1, 0.0, %v1451_v24  ;;  %v1455_v32 = vrot.slane %v1446_v23, 4  ;;  %v1463_v33 = vperm.slane %v1459_v27, %v2593_v28 }
 0x403   : > { %v1475_v34 = vrot.slane %v1458_v30, 4  ;;  %v1465_v35 = vsel %vm552_vm1, %v1464_v29, %v1452_v31  ;;  %v1470_v36 = vsel %vm552_vm1, %v1457_v26, %v1446_v23 }
 0x404   : > { %v1456_v37 = vsel %vm552_vm1, 0.0, %v1455_v32  ;;  %v1469_v38 = vperm.slane %v1465_v35, %v2593_v28  ;;  %v1474_v39 = vperm.slane %v1470_v36, %v2593_v28  ;;  %v1483_v40 = vrot.slane %v1463_v33, 4 }
 0x405   : > { %v1476_v41 = vsel %vm552_vm1, %v1475_v34, %v1456_v37 }
 0x406   : > { %v1480_v43 = vperm.slane %v1476_v41, %v2593_v28  ;;  %v1484_v44 = vsel %vm552_vm1, %v1469_v38, %v1483_v40  ;;  %v1495_v45 = vrot.slane %v1474_v39, 4  ;;  %v1481_v46 = vrot.slane %v1469_v38, 4 }
 0x407   : > { %v1492_v47 = vperm.slane %v1484_v44, %v2603_v42 }
 0x408   : > { %v1496_v48 = vsel %vm552_vm1, %v1480_v43, %v1495_v45  ;;  %v1482_v49 = vsel %vm552_vm1, %v1481_v46, %v1463_v33  ;;  %v1493_v50 = vrot.slane %v1480_v43, 4 }
 0x409   : > { %v1504_v51 = vperm.slane %v1496_v48, %v2603_v42  ;;  %v1511_v52 = vrot.slane %v1492_v47, 4  ;;  %v1488_v53 = vperm.slane %v1482_v49, %v2603_v42 }
 0x40a   : > { %v1494_v54 = vsel %vm552_vm1, %v1493_v50, %v1474_v39 }
 0x40b   : > { %v1512_v28 = vsel %vm552_vm1, %v1504_v51, %v1511_v52  ;;  %v1509_v55 = vrot.slane %v1504_v51, 4  ;;  %v1500_v56 = vperm.slane %v1494_v54, %v2603_v42  ;;  %v1507_v57 = vrot.slane %v1488_v53, 4  ;;  %v1532_v42 = vld [vmem:[#allocation17 + $0x8] sm:$0xff] }
 0x40c   : > { %1522 = vrot.lane.b32.xlu0 %v1512_v28, %s2352_s5  ;;  %1552 = vmatpush.msra.mxu2 %v1532_v42 }
 0x40d   : > { %v1510_v58 = vsel %vm552_vm1, %v1509_v55, %v1492_v47  ;;  %v1505_v59 = vrot.slane %v1500_v56, 4  ;;  %v1508_v18 = vsel %vm552_vm1, %v1500_v56, %v1507_v57 }
 0x40e   : > { %1518 = vrot.lane.b32.xlu2 %v1510_v58, %s2353_s24  ;;  %1514 = vrot.lane.b32.xlu1 %v1508_v18, %s2354_s9 }
 0x40f   : > { %v1506_v60 = vsel %vm552_vm1, %v1505_v59, %v1488_v53  ;;  %1553 = vmatpush.msra.mxu2 %v1531_v63 }
 0x468   : > { %v1519_v1 = vpop.permute.xlu2 %1518 }
 0x47e   : > { %v1523_v3 = vpop.permute.xlu0 %1522 }
 0x480   : > { %v1515_v0 = vpop.permute.xlu1 %1514 }
 0x481   : > { %v1525_v2 = vsel %vm662_vm2, %v1506_v60, %v1515_v0 }
 0x482   : > { %v1527_v4 = vsel %vm1526_vm7, %v1525_v2, %v1519_v1 }
 0x483   : > { %v1529_v5 = vsel %vm1528_vm8, %v1527_v4, %v1523_v3 }
 0x484   : > { %1835 = vmatmul.msk.f32.vlgmr.msra.gmra.mxu2 %vm516_vm0, %v1529_v5  ;;  %1530 = vst.msk [vmem:[%s506_s10] sm:$0xff] %vm516_vm0, %v1529_v5 }
 0x485   : > { %2237 = shalt.err (!%p2234_p13)
}
 0x486   : > { %1865 = dma.vmem_to_hbm [thread:$0]  (%p2488_p2), %s1594_s26, 128, %s1596_s12, %s1565_s14  }
 0x487   : > { %s1576_s17 = scalar_lea.hbm %s2876_s7, %s1838_s1  ;;  %s499_s16 = scalar_lea.vmem [#allocation18], %s2560_s4 }
 0x488   : > { %s1578_s5 = sshll.u32 %s499_s16, 4  ;;  %s1580_s24 = sshll.u32 %s1576_s17, 4  ;;  %s1579_s5 = int_to_ptr.vmem [resolvable:$true] %s1578_s5  ;;  %s1581_s24 = int_to_ptr.hbm [resolvable:$true] %s1580_s24 }
 0x489   : > { %s1560_s9 = scalar_lea.sflag [#allocation8], %s2557_s3  ;;  %s2252_s10 = sshra.s32 %s1581_s24, 4  ;;  %s2253_s10 = int_to_ptr.hbm [resolvable:$true] %s2252_s10 }
 0x48a   : > { %s2254_s13 = scalar_lea.hbm %s2253_s10, 8  ;;  %s2258_s1 = scalar_lea.hbm %s2876_s7, 16 }
 0x48b   : > { %p2255_p0 = scmp.ne.s32.totalorder %s2253_s10, %s2254_s13  ;;  %p2259_p8 = scmp.lt.s32.totalorder %s2253_s10, %s2876_s7 }
 0x48c   : > { %p2260_p1 = scmp.lt.s32.totalorder %s2258_s1, %s2254_s13 }
 0x48d   : > { %p2256_p4 = pnand %p2255_p0, %p2488_p2 }
 0x48e   : > { %p2261_p3 = por %p2260_p1, %p2259_p8 }
 0x48f   : > { %p2257_p9 = pneg %p2256_p4 }
 0x491   : > { %p2262_p5 = pnand %p2261_p3, %p2257_p9 }
 0x507   : > { %v1555_v6 = vpop.f32.mrf.mxu2 }
 0x508   : > { %1558 = vst.msk [vmem:[%s499_s16] sm:$0xff] %vm516_vm0, %v1555_v6 }
 0x509   : > { %2265 = shalt.err (!%p2262_p5)
}
 0x50a   : > { %1864 = dma.vmem_to_hbm [thread:$0]  (%p2488_p2), %s1579_s5, 128, %s1581_s24, %s1560_s9  }
 0x50b PF: > { %s2916_s12 = sld [smem:[#allocation28_spill]]  ;;  %s1607_s14 = sand.u32 1, %s2316_s27  }
 0x50c   : > { %p1892_p10 = pnand %p1803_p6, %p2495_p7  ;;  %s1608_s18 = scalar_lea.sflag [#allocation8], %s1607_s14 }
 0x50e   : > { %p1893_p11 = pneg %p1892_p10 }
 0x510   : > { %2307 = dma.done.wait (%p1893_p11), %s1608_s18, 128  }
 0x511   : > { %2309 = vsyncadd (%p1893_p11), %s1608_s18, 4294967168  ;;  %s1618_s6 = scalar_lea.sflag [#allocation20], %s1607_s14 }
 0x512   : > { %2311 = dma.done.wait (%p1893_p11), %s1618_s6, 128  }
 0x513   : > { %2313 = vsyncadd (%p1893_p11), %s1618_s6, 4294967168  ;;  %s33_s10 = sadd.s32 1, %s2916_s12   ;;  %s2917_s19 = sld [smem:[#allocation30_spill]] }
 0x514   : > { %p30_p12 = scmp.ge.s32.totalorder %s33_s10, 4   ;;  %s2918_s30 = sld [smem:[#allocation27_spill]] }
 0x515   : > { %s2919_s9 = sld [smem:[#allocation29_spill]]  ;;  %s2920_s27 = smov %s2320_s28 }
 0x516   : > { %s2921_s28 = smov %s2324_s29  ;;  %32 = sbr.rel (!%p30_p12) target bundleno = 19 (0x13), region = 158 }
 0x519   : > { %s2922_s29 = smov %s2917_s19 }
 0x51b   :  { %1624 = vsyncpa [#allocation7], 1 }
 0x51c   :  { %1626 = vsyncpa [#allocation7 + $0x1], 1 }
 0x51d   :  { %1627 = vsyncpa [#allocation10], 1 }
 0x51e   :  { %1629 = vsyncpa [#allocation10 + $0x1], 1 }
 0x51f   :  { %1630 = vsyncpa [#allocation13], 1 }
 0x520   :  { %1631 = vsyncpa [#allocation16], 1 }
 0x521   :  { %1632 = vsyncpa [#allocation8], 1 }
 0x522   :  { %1634 = vsyncpa [#allocation8 + $0x1], 1 }
 0x523   :  { %1635 = vsyncpa [#allocation20], 1 }
 0x524   :  { %1637 = vsyncpa [#allocation20 + $0x1], 1 }

</bundles_post_ra>
